<compile_context>
chip_gen: v5e
topology: v5e:2x2
jax: 0.10.0
libtpu: 0.0.40
codegen_flags: <defaults>
</compile_context>

<pallas_src>
import functools

import jax
import jax.numpy as jnp
import numpy as np
from jax.experimental import pallas as pl
from jax.experimental.pallas import tpu as pltpu

F32 = jnp.float32
BF16 = jnp.bfloat16
BN_EPS = 1e-5
VMEM_LIMIT = 32 * 1024 * 1024


def _round_up(x, m):
    return ((x + m - 1) // m) * m


# ------------------ Kernel 1: PAM + CAM (channel-major, one batch per step) ------------------
def _pam_cam_kernel(x_ref, w_ref, b_ref, alpha_ref, beta_ref, out_ref, *, seg):
    # x_ref block: (1, C, S) -- channels on sublanes, spatial on lanes (lane dense).
    x = x_ref[0]                                         # (C, S) f32
    alpha = alpha_ref[0, 0]
    beta = beta_ref[0, 0]

    # Fused 1x1 projections (conv_b / conv_c / conv_d) as one GEMM; each segment
    # is padded to an 8-sublane boundary (padded rows/biases are exactly zero).
    proj = jnp.dot(w_ref[...], x, preferred_element_type=F32) + b_ref[...]    # (2*seg+C, S)
    fb = proj[:seg]                                      # (seg, S), rows >= C8 are zero
    fc = proj[seg:2 * seg]                               # (seg, S)
    fd = proj[2 * seg:]                                  # (C, S)

    # --- Position attention ---------------------------------------------------
    # energy[s, t] = sum_c fb[c, s] * fc[c, t]   (bf16 operands, f32 accumulate)
    energy = jax.lax.dot_general(
        fb.astype(BF16), fc.astype(BF16),
        (((0,), (0,)), ((), ())), preferred_element_type=F32)                 # (S, S)
    energy = energy - jnp.max(energy, axis=-1, keepdims=True)
    p = jnp.exp(energy)
    att_s = p * pl.reciprocal(jnp.sum(p, axis=-1, keepdims=True), approx=True)
    # feat_e[c, s] = sum_t fd[c, t] * att_s[s, t]   (last-dim contraction, bf16 in)
    feat_e = jax.lax.dot_general(
        fd.astype(BF16), att_s.astype(BF16),
        (((1,), (1,)), ((), ())), preferred_element_type=F32)                 # (C, S)
    x1 = alpha * feat_e + x

    # --- Channel attention (kept f32: near-argmin sensitive) -------------------
    gram = jax.lax.dot_general(x1, x1, (((1,), (1,)), ((), ())),
                               preferred_element_type=F32)                    # (C, C)
    # softmax(rowmax(gram) - gram) == softmax over (rowmin(gram) - gram).
    q = jnp.exp(jnp.min(gram, axis=-1, keepdims=True) - gram)
    att_c = q / jnp.sum(q, axis=-1, keepdims=True)        # exact divide
    fe2 = jnp.dot(att_c, x1, preferred_element_type=F32)                      # (C, S)
    out_ref[0] = beta * fe2 + x1                          # lane-dense store


# -------- Kernel 2: conv3x3 GEMM + BN + ReLU + MaxPool (VPU pooling, lane-dense) --------
def _conv_bn_pool_kernel(w_ref, cols_ref, mask_ref, bconv_ref, gamma_ref, betab_ref,
                         out_ref, *, count, eps, m_pad):
    # Conv3x3 as one bf16 GEMM (f32 accumulate): (2*ct, 12C) @ (12C, 2*Mpad).
    # Row halves = width parity (w = 2j / 2j+1); column halves = MaxPool height
    # parity (source rows ha(i) / hb(i)).
    y = jnp.dot(w_ref[...], cols_ref[...], preferred_element_type=F32)
    ct = y.shape[0] // 2
    bias = bconv_ref[...]                                 # (ct, 1)
    y0 = y[:ct] + bias
    y1 = y[ct:] + bias
    mask = mask_ref[...]                                  # (1, 2*Mpad): 1 on unique real cols

    # Training-mode BatchNorm: per-channel stats over all (B, H, W) positions;
    # the mask removes the duplicated boundary rows and the lane padding.
    inv_n = 1.0 / count
    mean = jnp.sum((y0 + y1) * mask, axis=1, keepdims=True) * inv_n
    d0 = y0 - mean
    d1 = y1 - mean
    var = jnp.sum((d0 * d0 + d1 * d1) * mask, axis=1, keepdims=True) * inv_n
    scale = gamma_ref[...] * jax.lax.rsqrt(var + eps)
    z0 = jnp.maximum(d0 * scale + betab_ref[...], 0.0)    # BN + ReLU
    z1 = jnp.maximum(d1 * scale + betab_ref[...], 0.0)

    # MaxPool 2x2/2 with pad=(1,0): width = max of parity row halves,
    # height = max of the two contiguous (lane-aligned) column halves.
    wmax = jnp.maximum(z0, z1)                            # (ct, 2*Mpad)
    out_ref[...] = jnp.maximum(wmax[:, :m_pad], wmax[:, m_pad:])


# ---------------------------------------- Wrapper ----------------------------------------
def _default_n_ct():
    # Two channel tiles only where there are two TensorCores to shard them onto.
    try:
        kind = jax.devices()[0].device_kind.lower()
    except Exception:
        return 1
    return 2 if "v7" in kind else 1


def tofr_forward(x_nchw, params, *, n_ct=None):
    B, C, H, W = x_nchw.shape
    assert C % 8 == 0 and H % 2 == 0 and W % 2 == 0, "kernel assumes even H/W, C%8==0"
    S = H * W
    C2 = params["wconv"].shape[0]
    C8 = params["wb"].shape[0]
    Hout, Wout = H // 2 + 1, W // 2
    if n_ct is None:
        n_ct = _default_n_ct()
    assert C2 % n_ct == 0 and (C2 // n_ct) % 8 == 0
    ct = C2 // n_ct

    # ---------------- Kernel 1: PAM + CAM, channel-major ----------------
    x_s = x_nchw.reshape(B, C, S).astype(F32)             # NCHW -> (B, C, S): free reshape

    seg = _round_up(max(C8, 1), 8)                        # aligned projection segments
    R = 2 * seg + C
    zw = jnp.zeros((seg - C8, C), F32)
    zb = jnp.zeros((seg - C8,), F32)
    w_all = jnp.concatenate(
        [params["wb"].astype(F32), zw, params["wc"].astype(F32), zw,
         params["wd"].astype(F32)], axis=0)                                   # (R, C)
    b_all = jnp.concatenate(
        [params["bb"], zb, params["bc"], zb, params["bd"]])[:, None]          # (R, 1)

    x2_s = pl.pallas_call(
        functools.partial(_pam_cam_kernel, seg=seg),
        out_shape=jax.ShapeDtypeStruct((B, C, S), F32),
        grid=(B,),
        in_specs=[
            pl.BlockSpec((1, C, S), lambda b: (b, 0, 0)),
            pl.BlockSpec((R, C), lambda b: (0, 0)),
            pl.BlockSpec((R, 1), lambda b: (0, 0)),
            pl.BlockSpec(memory_space=pltpu.MemorySpace.SMEM),
            pl.BlockSpec(memory_space=pltpu.MemorySpace.SMEM),
        ],
        out_specs=pl.BlockSpec((1, C, S), lambda b: (b, 0, 0)),
        compiler_params=pltpu.CompilerParams(
            dimension_semantics=("parallel",),
            vmem_limit_bytes=VMEM_LIMIT),
    )(x_s, w_all, b_all,
      params["alpha"].reshape(1, 1), params["beta"].reshape(1, 1))

    # ---- width-pair / height-parity im2col (pure layout plumbing, XLA side) ----
    # Column order: (h_parity p, b, pooled row i, width pair j); row order (c, tap)
    # with tap = dh*4 + dwp.  cols[c*12+tap, (p,b,i,j)] = xpad[b, c, hsrc(p,i)+dh, 2j+dwp].
    x2_img = x2_s.reshape(B, C, H, W)
    xp = jnp.pad(x2_img, ((0, 0), (0, 0), (1, 1), (1, 1)))
    rows_a = np.array([max(2 * i - 1, 0) for i in range(Hout)], np.int32)     # ha(i)
    rows_b = np.array([min(2 * i, H - 1) for i in range(Hout)], np.int32)     # hb(i)
    pieces = []
    for dh in range(3):
        for dwp in range(4):
            win = xp[:, :, dh:dh + H, dwp:dwp + 2 * Wout:2]    # (B, C, H, Wout)
            pieces.append(jnp.stack([win[:, :, rows_a, :],
                                     win[:, :, rows_b, :]], axis=0))          # (2,B,C,Hout,Wout)
    cols = jnp.stack(pieces, axis=3)                            # (p, b, c, tap, i, j)
    M = B * Hout * Wout
    Mpad = _round_up(M, 128)
    cols = cols.transpose(2, 3, 0, 1, 4, 5).reshape(12 * C, 2, M)
    cols = jnp.pad(cols, ((0, 0), (0, 0), (0, Mpad - M)))
    cols = cols.reshape(12 * C, 2 * Mpad).astype(BF16)

    # Conv weight in width-pair form; rows grouped per channel tile: [tile t: parity0 | parity1].
    left = jnp.pad(params["wconv"], ((0, 0), (0, 0), (0, 0), (0, 1))).reshape(C2, 12 * C)
    right = jnp.pad(params["wconv"], ((0, 0), (0, 0), (0, 0), (1, 0))).reshape(C2, 12 * C)
    w12 = (jnp.stack([left, right], axis=0)                     # (2, C2, 12C)
           .reshape(2, n_ct, ct, 12 * C)
           .transpose(1, 0, 2, 3)
           .reshape(2 * C2, 12 * C)).astype(BF16)

    # BatchNorm-statistics mask: count every (b, h, w) exactly once -- drop the
    # duplicated boundary rows (i=0 and i=Hout-1 in the "b" half) and the lane padding.
    mask_np = np.zeros((2, Mpad), np.float32)
    mask_np[0, :M] = 1.0
    mb = np.ones((B, Hout, Wout), np.float32)
    mb[:, 0, :] = 0.0
    mb[:, Hout - 1, :] = 0.0
    mask_np[1, :M] = mb.reshape(-1)
    mask = jnp.asarray(mask_np.reshape(1, 2 * Mpad))

    out_t = pl.pallas_call(
        functools.partial(_conv_bn_pool_kernel, count=float(B * H * W),
                          eps=BN_EPS, m_pad=Mpad),
        out_shape=jax.ShapeDtypeStruct((C2, Mpad), F32),
        grid=(n_ct,),
        in_specs=[
            pl.BlockSpec((2 * ct, 12 * C), lambda t: (t, 0)),
            pl.BlockSpec((12 * C, 2 * Mpad), lambda t: (0, 0)),
            pl.BlockSpec((1, 2 * Mpad), lambda t: (0, 0)),
            pl.BlockSpec((ct, 1), lambda t: (t, 0)),
            pl.BlockSpec((ct, 1), lambda t: (t, 0)),
            pl.BlockSpec((ct, 1), lambda t: (t, 0)),
        ],
        out_specs=pl.BlockSpec((ct, Mpad), lambda t: (t, 0)),
        compiler_params=pltpu.CompilerParams(
            dimension_semantics=("parallel",),
            vmem_limit_bytes=VMEM_LIMIT),
    )(w12, cols, mask, params["bconv"][:, None], params["gamma"][:, None],
      params["betabn"][:, None])

    # (C2, Mpad) -> slice the real columns -> NCHW
    return out_t[:, :M].reshape(C2, B, Hout, Wout).transpose(1, 0, 2, 3)


# ---------------------------------- Pure-JAX reference ----------------------------------
def reference_forward(x, p):
    hp = jax.lax.Precision.HIGHEST
    B, C, H, W = x.shape
    S = H * W
    xa = x.reshape(B, C, S)
    fb = jnp.einsum("oc,bcs->bos", p["wb"], xa, precision=hp) + p["bb"][None, :, None]
    fc = jnp.einsum("oc,bcs->bos", p["wc"], xa, precision=hp) + p["bc"][None, :, None]
    fd = jnp.einsum("oc,bcs->bos", p["wd"], xa, precision=hp) + p["bd"][None, :, None]
    energy = jnp.einsum("bcs,bct->bst", fb, fc, precision=hp)
    att_s = jax.nn.softmax(energy, axis=-1)
    feat_e = jnp.einsum("bcs,bts->bct", fd, att_s, precision=hp)
    x1 = p["alpha"][0] * feat_e + xa
    att = jnp.einsum("bcs,bds->bcd", x1, x1, precision=hp)
    att_new = jnp.max(att, axis=-1, keepdims=True) - att
    att2 = jax.nn.softmax(att_new, axis=-1)
    fe2 = jnp.einsum("bcd,bds->bcs", att2, x1, precision=hp)
    x2 = (p["beta"][0] * fe2 + x1).reshape(B, C, H, W)
    y = jax.lax.conv_general_dilated(x2, p["wconv"], (1, 1), ((1, 1), (1, 1)),
                                     dimension_numbers=("NCHW", "OIHW", "NCHW"),
                                     precision=hp)
    y = y + p["bconv"][None, :, None, None]
    mean = jnp.mean(y, axis=(0, 2, 3), keepdims=True)
    var = jnp.mean(jnp.square(y - mean), axis=(0, 2, 3), keepdims=True)
    yn = (y - mean) / jnp.sqrt(var + BN_EPS) * p["gamma"][None, :, None, None] \
         + p["betabn"][None, :, None, None]
    yr = jnp.maximum(yn, 0.0)
    yp = jnp.pad(yr, ((0, 0), (0, 0), (1, 1), (0, 0)), constant_values=-jnp.inf)
    return jax.lax.reduce_window(yp, -jnp.inf, jax.lax.max,
                                 (1, 1, 2, 2), (1, 1, 2, 2), "VALID")


def make_params(key, C):
    C8 = C // 8
    C2 = 2 * C
    keys = jax.random.split(key, 8)
    return {
        "wb": 0.2 * jax.random.normal(keys[0], (C8, C), F32),
        "bb": 0.1 * jax.random.normal(keys[1], (C8,), F32),
        "wc": 0.2 * jax.random.normal(keys[2], (C8, C), F32),
        "bc": 0.1 * jax.random.normal(keys[3], (C8,), F32),
        "wd": 0.2 * jax.random.normal(keys[4], (C, C), F32),
        "bd": 0.1 * jax.random.normal(keys[5], (C,), F32),
        # torch initializes alpha/beta to 0; use nonzero values so both attention
        # paths are exercised (beta kept modest: CAM is a near-argmin amplifier).
        "alpha": jnp.array([0.5], F32),
        "beta": jnp.array([0.2], F32),
        "wconv": (1.0 / np.sqrt(9 * C)) * jax.random.normal(keys[6], (C2, C, 3, 3), F32),
        "bconv": 0.1 * jax.random.normal(keys[7], (C2,), F32),
        "gamma": jnp.ones((C2,), F32),
        "betabn": jnp.zeros((C2,), F32),
    }


if __name__ == "__main__":
    B, C, H, W = 2, 16, 16, 16
    key = jax.random.PRNGKey(0)
    kx, kp = jax.random.split(key)
    x = jax.random.normal(kx, (B, C, H, W), F32)
    params = make_params(kp, C)

    out = jax.jit(tofr_forward)(x, params)
    out = jax.block_until_ready(out)

    ref = reference_forward(x, params)
    assert out.shape == ref.shape == (B, 2 * C, H // 2 + 1, W // 2), (out.shape, ref.shape)
    # bf16 MXU operands (per perf review) + CAM near-argmin amplification motivate
    # a slightly looser tolerance than the pure-f32 pipeline used previously.
    np.testing.assert_allclose(np.asarray(out), np.asarray(ref), rtol=3e-2, atol=3e-2)

    print("KERNEL_OK")
</pallas_src>

<mosaic_0001>
module attributes {stable_mosaic.version = 11 : i64} {
  func.func @_pam_cam_kernel(%arg0: i32, %arg1: memref<1x16x256xf32, #tpu.memory_space<vmem>>, %arg2: memref<32x16xf32, #tpu.memory_space<vmem>>, %arg3: memref<32x1xf32, #tpu.memory_space<vmem>>, %arg4: memref<1x1xf32, #tpu.memory_space<smem>>, %arg5: memref<1x1xf32, #tpu.memory_space<smem>>, %arg6: memref<1x16x256xf32, #tpu.memory_space<vmem>>) attributes {dimension_semantics = [#tpu.dimension_semantics<parallel>], iteration_bounds = array<i64: 2>, scalar_prefetch = 0 : i64, scratch_operands = 0 : i64, tpu.core_type = #tpu.core_type<tc>, window_params = [{transform_indices = @transform_0, window_bounds = array<i64: 1, 16, 256>}, {pipeline_mode = #tpu.pipeline_mode<synchronous>, transform_indices = @transform_1, window_bounds = array<i64: 32, 16>}, {pipeline_mode = #tpu.pipeline_mode<synchronous>, transform_indices = @transform_2, window_bounds = array<i64: 32, 1>}, {transform_indices = @transform_3, window_bounds = array<i64: 1, 1>}, {transform_indices = @transform_4, window_bounds = array<i64: 1, 1>}, {transform_indices = @transform_5, window_bounds = array<i64: 1, 16, 256>}]} {
    %c0 = arith.constant 0 : index
    %c0_0 = arith.constant 0 : index
    %c0_1 = arith.constant 0 : index
    %0 = vector.load %arg1[%c0, %c0_0, %c0_1] : memref<1x16x256xf32, #tpu.memory_space<vmem>>, vector<1x16x256xf32>
    %1 = vector.shape_cast %0 : vector<1x16x256xf32> to vector<16x256xf32>
    %c0_2 = arith.constant 0 : index
    %c0_3 = arith.constant 0 : index
    %2 = memref.load %arg4[%c0_2, %c0_3] : memref<1x1xf32, #tpu.memory_space<smem>>
    %c0_4 = arith.constant 0 : index
    %c0_5 = arith.constant 0 : index
    %3 = memref.load %arg5[%c0_4, %c0_5] : memref<1x1xf32, #tpu.memory_space<smem>>
    %c0_6 = arith.constant 0 : index
    %c0_7 = arith.constant 0 : index
    %4 = vector.load %arg2[%c0_6, %c0_7] : memref<32x16xf32, #tpu.memory_space<vmem>>, vector<32x16xf32>
    %cst = arith.constant dense<0.000000e+00> : vector<32x256xf32>
    %5 = tpu.matmul %4, %1, %cst {dimension_numbers = #tpu.dot_dimension_numbers<[1], [0], [0], [1], [0, 0, 1, 1], [], []>} : vector<32x16xf32>, vector<16x256xf32>, vector<32x256xf32> -> vector<32x256xf32>
    %c0_8 = arith.constant 0 : index
    %c0_9 = arith.constant 0 : index
    %6 = vector.load %arg3[%c0_8, %c0_9] : memref<32x1xf32, #tpu.memory_space<vmem>>, vector<32x1xf32>
    %7 = vector.broadcast %6 : vector<32x1xf32> to vector<32x256xf32>
    %8 = arith.addf %5, %7 : vector<32x256xf32>
    %9 = vector.extract_strided_slice %8 {offsets = [0, 0], sizes = [8, 256], strides = [1, 1]} : vector<32x256xf32> to vector<8x256xf32>
    %10 = vector.extract_strided_slice %8 {offsets = [8, 0], sizes = [8, 256], strides = [1, 1]} : vector<32x256xf32> to vector<8x256xf32>
    %11 = vector.extract_strided_slice %8 {offsets = [16, 0], sizes = [16, 256], strides = [1, 1]} : vector<32x256xf32> to vector<16x256xf32>
    %12 = arith.truncf %9 : vector<8x256xf32> to vector<8x256xbf16>
    %13 = arith.truncf %10 : vector<8x256xf32> to vector<8x256xbf16>
    %cst_10 = arith.constant dense<0.000000e+00> : vector<256x256xf32>
    %14 = tpu.matmul %12, %13, %cst_10 {dimension_numbers = #tpu.dot_dimension_numbers<[0], [0], [1], [1], [0, 1, 1, 1], [], []>} : vector<8x256xbf16>, vector<8x256xbf16>, vector<256x256xf32> -> vector<256x256xf32>
    %cst_11 = arith.constant dense<0xFF800000> : vector<256xf32>
    %15 = vector.multi_reduction <maximumf>, %14, %cst_11 [1] : vector<256x256xf32> to vector<256xf32>
    %16 = vector.shape_cast %15 : vector<256xf32> to vector<256x1xf32>
    %17 = vector.broadcast %16 : vector<256x1xf32> to vector<256x256xf32>
    %18 = arith.subf %14, %17 : vector<256x256xf32>
    %19 = math.exp %18 : vector<256x256xf32>
    %cst_12 = arith.constant dense<0.000000e+00> : vector<256xf32>
    %20 = vector.multi_reduction <add>, %19, %cst_12 [1] : vector<256x256xf32> to vector<256xf32>
    %21 = vector.shape_cast %20 : vector<256xf32> to vector<256x1xf32>
    %22 = tpu.reciprocal %21 {approx = true} : vector<256x1xf32> -> vector<256x1xf32>
    %23 = vector.broadcast %22 : vector<256x1xf32> to vector<256x256xf32>
    %24 = arith.mulf %19, %23 : vector<256x256xf32>
    %25 = arith.truncf %11 : vector<16x256xf32> to vector<16x256xbf16>
    %26 = arith.truncf %24 : vector<256x256xf32> to vector<256x256xbf16>
    %cst_13 = arith.constant dense<0.000000e+00> : vector<16x256xf32>
    %27 = tpu.matmul %25, %26, %cst_13 {dimension_numbers = #tpu.dot_dimension_numbers<[1], [1], [0], [0], [0, 0, 1, 0], [], []>} : vector<16x256xbf16>, vector<256x256xbf16>, vector<16x256xf32> -> vector<16x256xf32>
    %28 = vector.broadcast %2 : f32 to vector<16x256xf32>
    %29 = arith.mulf %28, %27 : vector<16x256xf32>
    %30 = arith.addf %29, %1 : vector<16x256xf32>
    %cst_14 = arith.constant dense<0.000000e+00> : vector<16x16xf32>
    %31 = tpu.matmul %30, %30, %cst_14 {dimension_numbers = #tpu.dot_dimension_numbers<[1], [1], [0], [0], [0, 0, 1, 0], [], []>} : vector<16x256xf32>, vector<16x256xf32>, vector<16x16xf32> -> vector<16x16xf32>
    %cst_15 = arith.constant dense<0x7F800000> : vector<16xf32>
    %32 = vector.multi_reduction <minimumf>, %31, %cst_15 [1] : vector<16x16xf32> to vector<16xf32>
    %33 = vector.shape_cast %32 : vector<16xf32> to vector<16x1xf32>
    %34 = vector.broadcast %33 : vector<16x1xf32> to vector<16x16xf32>
    %35 = arith.subf %34, %31 : vector<16x16xf32>
    %36 = math.exp %35 : vector<16x16xf32>
    %cst_16 = arith.constant dense<0.000000e+00> : vector<16xf32>
    %37 = vector.multi_reduction <add>, %36, %cst_16 [1] : vector<16x16xf32> to vector<16xf32>
    %38 = vector.shape_cast %37 : vector<16xf32> to vector<16x1xf32>
    %39 = vector.broadcast %38 : vector<16x1xf32> to vector<16x16xf32>
    %40 = arith.divf %36, %39 : vector<16x16xf32>
    %cst_17 = arith.constant dense<0.000000e+00> : vector<16x256xf32>
    %41 = tpu.matmul %40, %30, %cst_17 {dimension_numbers = #tpu.dot_dimension_numbers<[1], [0], [0], [1], [0, 0, 1, 1], [], []>} : vector<16x16xf32>, vector<16x256xf32>, vector<16x256xf32> -> vector<16x256xf32>
    %42 = vector.broadcast %3 : f32 to vector<16x256xf32>
    %43 = arith.mulf %42, %41 : vector<16x256xf32>
    %44 = arith.addf %43, %30 : vector<16x256xf32>
    %c0_18 = arith.constant 0 : index
    %c0_19 = arith.constant 0 : index
    %c0_20 = arith.constant 0 : index
    %45 = vector.load %arg6[%c0_18, %c0_19, %c0_20] : memref<1x16x256xf32, #tpu.memory_space<vmem>>, vector<1x16x256xf32>
    %46 = vector.shape_cast %45 : vector<1x16x256xf32> to vector<16x256xf32>
    %47 = vector.shape_cast %44 : vector<16x256xf32> to vector<1x16x256xf32>
    tpu.vector_store %arg6[%c0_18, %c0_19, %c0_20], %47 {strides = array<i32>} : memref<1x16x256xf32, #tpu.memory_space<vmem>>, vector<1x16x256xf32>,
    return
  }
  func.func @transform_0(%arg0: i32) -> (i32, i32, i32) {
    %c0_i32 = arith.constant 0 : i32
    %c0_i32_0 = arith.constant 0 : i32
    %c0_i32_1 = arith.constant 0 : i32
    return %arg0, %c0_i32, %c0_i32_0 : i32, i32, i32
  }
  func.func @transform_1(%arg0: i32) -> (i32, i32) {
    %c0_i32 = arith.constant 0 : i32
    %c0_i32_0 = arith.constant 0 : i32
    %c0_i32_1 = arith.constant 0 : i32
    return %c0_i32, %c0_i32_0 : i32, i32
  }
  func.func @transform_2(%arg0: i32) -> (i32, i32) {
    %c0_i32 = arith.constant 0 : i32
    %c0_i32_0 = arith.constant 0 : i32
    %c0_i32_1 = arith.constant 0 : i32
    return %c0_i32, %c0_i32_0 : i32, i32
  }
  func.func @transform_3(%arg0: i32) -> (i32, i32) {
    %c0_i32 = arith.constant 0 : i32
    %c0_i32_0 = arith.constant 0 : i32
    %c0_i32_1 = arith.constant 0 : i32
    return %c0_i32, %c0_i32_0 : i32, i32
  }
  func.func @transform_4(%arg0: i32) -> (i32, i32) {
    %c0_i32 = arith.constant 0 : i32
    %c0_i32_0 = arith.constant 0 : i32
    %c0_i32_1 = arith.constant 0 : i32
    return %c0_i32, %c0_i32_0 : i32, i32
  }
  func.func @transform_5(%arg0: i32) -> (i32, i32, i32) {
    %c0_i32 = arith.constant 0 : i32
    %c0_i32_0 = arith.constant 0 : i32
    %c0_i32_1 = arith.constant 0 : i32
    return %arg0, %c0_i32, %c0_i32_0 : i32, i32, i32
  }
}

module attributes {stable_mosaic.version = 11 : i64} {
  func.func @_conv_bn_pool_kernel(%arg0: i32, %arg1: memref<64x192xbf16, #tpu.memory_space<vmem>>, %arg2: memref<192x512xbf16, #tpu.memory_space<vmem>>, %arg3: memref<1x512xf32, #tpu.memory_space<vmem>>, %arg4: memref<32x1xf32, #tpu.memory_space<vmem>>, %arg5: memref<32x1xf32, #tpu.memory_space<vmem>>, %arg6: memref<32x1xf32, #tpu.memory_space<vmem>>, %arg7: memref<32x256xf32, #tpu.memory_space<vmem>>) attributes {dimension_semantics = [#tpu.dimension_semantics<parallel>], iteration_bounds = array<i64: 1>, scalar_prefetch = 0 : i64, scratch_operands = 0 : i64, tpu.core_type = #tpu.core_type<tc>, window_params = [{transform_indices = @transform_0, window_bounds = array<i64: 64, 192>}, {pipeline_mode = #tpu.pipeline_mode<synchronous>, transform_indices = @transform_1, window_bounds = array<i64: 192, 512>}, {pipeline_mode = #tpu.pipeline_mode<synchronous>, transform_indices = @transform_2, window_bounds = array<i64: 1, 512>}, {transform_indices = @transform_3, window_bounds = array<i64: 32, 1>}, {transform_indices = @transform_4, window_bounds = array<i64: 32, 1>}, {transform_indices = @transform_5, window_bounds = array<i64: 32, 1>}, {transform_indices = @transform_6, window_bounds = array<i64: 32, 256>}]} {
    %c0 = arith.constant 0 : index
    %c0_0 = arith.constant 0 : index
    %0 = vector.load %arg1[%c0, %c0_0] : memref<64x192xbf16, #tpu.memory_space<vmem>>, vector<64x192xbf16>
    %c0_1 = arith.constant 0 : index
    %c0_2 = arith.constant 0 : index
    %1 = vector.load %arg2[%c0_1, %c0_2] : memref<192x512xbf16, #tpu.memory_space<vmem>>, vector<192x512xbf16>
    %cst = arith.constant dense<0.000000e+00> : vector<64x512xf32>
    %2 = tpu.matmul %0, %1, %cst {dimension_numbers = #tpu.dot_dimension_numbers<[1], [0], [0], [1], [0, 0, 1, 1], [], []>} : vector<64x192xbf16>, vector<192x512xbf16>, vector<64x512xf32> -> vector<64x512xf32>
    %c0_3 = arith.constant 0 : index
    %c0_4 = arith.constant 0 : index
    %3 = vector.load %arg4[%c0_3, %c0_4] : memref<32x1xf32, #tpu.memory_space<vmem>>, vector<32x1xf32>
    %4 = vector.extract_strided_slice %2 {offsets = [0, 0], sizes = [32, 512], strides = [1, 1]} : vector<64x512xf32> to vector<32x512xf32>
    %5 = vector.broadcast %3 : vector<32x1xf32> to vector<32x512xf32>
    %6 = arith.addf %4, %5 : vector<32x512xf32>
    %7 = vector.extract_strided_slice %2 {offsets = [32, 0], sizes = [32, 512], strides = [1, 1]} : vector<64x512xf32> to vector<32x512xf32>
    %8 = vector.broadcast %3 : vector<32x1xf32> to vector<32x512xf32>
    %9 = arith.addf %7, %8 : vector<32x512xf32>
    %c0_5 = arith.constant 0 : index
    %c0_6 = arith.constant 0 : index
    %10 = vector.load %arg3[%c0_5, %c0_6] : memref<1x512xf32, #tpu.memory_space<vmem>>, vector<1x512xf32>
    %11 = arith.addf %6, %9 : vector<32x512xf32>
    %12 = vector.broadcast %10 : vector<1x512xf32> to vector<32x512xf32>
    %13 = arith.mulf %11, %12 : vector<32x512xf32>
    %cst_7 = arith.constant dense<0.000000e+00> : vector<32xf32>
    %14 = vector.multi_reduction <add>, %13, %cst_7 [1] : vector<32x512xf32> to vector<32xf32>
    %15 = vector.shape_cast %14 : vector<32xf32> to vector<32x1xf32>
    %cst_8 = arith.constant 0.001953125 : f32
    %16 = vector.broadcast %cst_8 : f32 to vector<32x1xf32>
    %17 = arith.mulf %15, %16 : vector<32x1xf32>
    %18 = vector.broadcast %17 : vector<32x1xf32> to vector<32x512xf32>
    %19 = arith.subf %6, %18 : vector<32x512xf32>
    %20 = vector.broadcast %17 : vector<32x1xf32> to vector<32x512xf32>
    %21 = arith.subf %9, %20 : vector<32x512xf32>
    %22 = arith.mulf %19, %19 : vector<32x512xf32>
    %23 = arith.mulf %21, %21 : vector<32x512xf32>
    %24 = arith.addf %22, %23 : vector<32x512xf32>
    %25 = vector.broadcast %10 : vector<1x512xf32> to vector<32x512xf32>
    %26 = arith.mulf %24, %25 : vector<32x512xf32>
    %cst_9 = arith.constant dense<0.000000e+00> : vector<32xf32>
    %27 = vector.multi_reduction <add>, %26, %cst_9 [1] : vector<32x512xf32> to vector<32xf32>
    %28 = vector.shape_cast %27 : vector<32xf32> to vector<32x1xf32>
    %cst_10 = arith.constant 0.001953125 : f32
    %29 = vector.broadcast %cst_10 : f32 to vector<32x1xf32>
    %30 = arith.mulf %28, %29 : vector<32x1xf32>
    %c0_11 = arith.constant 0 : index
    %c0_12 = arith.constant 0 : index
    %31 = vector.load %arg5[%c0_11, %c0_12] : memref<32x1xf32, #tpu.memory_space<vmem>>, vector<32x1xf32>
    %cst_13 = arith.constant 9.99999974E-6 : f32
    %32 = vector.broadcast %cst_13 : f32 to vector<32x1xf32>
    %33 = arith.addf %30, %32 : vector<32x1xf32>
    %34 = math.rsqrt %33 : vector<32x1xf32>
    %35 = arith.mulf %31, %34 : vector<32x1xf32>
    %36 = vector.broadcast %35 : vector<32x1xf32> to vector<32x512xf32>
    %37 = arith.mulf %19, %36 : vector<32x512xf32>
    %c0_14 = arith.constant 0 : index
    %c0_15 = arith.constant 0 : index
    %38 = vector.load %arg6[%c0_14, %c0_15] : memref<32x1xf32, #tpu.memory_space<vmem>>, vector<32x1xf32>
    %39 = vector.broadcast %38 : vector<32x1xf32> to vector<32x512xf32>
    %40 = arith.addf %37, %39 : vector<32x512xf32>
    %cst_16 = arith.constant 0.000000e+00 : f32
    %41 = vector.broadcast %cst_16 : f32 to vector<32x512xf32>
    %42 = arith.maximumf %40, %41 : vector<32x512xf32>
    %43 = vector.broadcast %35 : vector<32x1xf32> to vector<32x512xf32>
    %44 = arith.mulf %21, %43 : vector<32x512xf32>
    %c0_17 = arith.constant 0 : index
    %c0_18 = arith.constant 0 : index
    %45 = vector.load %arg6[%c0_17, %c0_18] : memref<32x1xf32, #tpu.memory_space<vmem>>, vector<32x1xf32>
    %46 = vector.broadcast %45 : vector<32x1xf32> to vector<32x512xf32>
    %47 = arith.addf %44, %46 : vector<32x512xf32>
    %cst_19 = arith.constant 0.000000e+00 : f32
    %48 = vector.broadcast %cst_19 : f32 to vector<32x512xf32>
    %49 = arith.maximumf %47, %48 : vector<32x512xf32>
    %50 = arith.maximumf %42, %49 : vector<32x512xf32>
    %51 = vector.extract_strided_slice %50 {offsets = [0, 0], sizes = [32, 256], strides = [1, 1]} : vector<32x512xf32> to vector<32x256xf32>
    %52 = vector.extract_strided_slice %50 {offsets = [0, 256], sizes = [32, 256], strides = [1, 1]} : vector<32x512xf32> to vector<32x256xf32>
    %53 = arith.maximumf %51, %52 : vector<32x256xf32>
    %c0_20 = arith.constant 0 : index
    %c0_21 = arith.constant 0 : index
    %54 = vector.load %arg7[%c0_20, %c0_21] : memref<32x256xf32, #tpu.memory_space<vmem>>, vector<32x256xf32>
    tpu.vector_store %arg7[%c0_20, %c0_21], %53 {strides = array<i32>} : memref<32x256xf32, #tpu.memory_space<vmem>>, vector<32x256xf32>,
    return
  }
  func.func @transform_0(%arg0: i32) -> (i32, i32) {
    %c0_i32 = arith.constant 0 : i32
    %c0_i32_0 = arith.constant 0 : i32
    return %arg0, %c0_i32 : i32, i32
  }
  func.func @transform_1(%arg0: i32) -> (i32, i32) {
    %c0_i32 = arith.constant 0 : i32
    %c0_i32_0 = arith.constant 0 : i32
    %c0_i32_1 = arith.constant 0 : i32
    return %c0_i32, %c0_i32_0 : i32, i32
  }
  func.func @transform_2(%arg0: i32) -> (i32, i32) {
    %c0_i32 = arith.constant 0 : i32
    %c0_i32_0 = arith.constant 0 : i32
    %c0_i32_1 = arith.constant 0 : i32
    return %c0_i32, %c0_i32_0 : i32, i32
  }
  func.func @transform_3(%arg0: i32) -> (i32, i32) {
    %c0_i32 = arith.constant 0 : i32
    %c0_i32_0 = arith.constant 0 : i32
    return %arg0, %c0_i32 : i32, i32
  }
  func.func @transform_4(%arg0: i32) -> (i32, i32) {
    %c0_i32 = arith.constant 0 : i32
    %c0_i32_0 = arith.constant 0 : i32
    return %arg0, %c0_i32 : i32, i32
  }
  func.func @transform_5(%arg0: i32) -> (i32, i32) {
    %c0_i32 = arith.constant 0 : i32
    %c0_i32_0 = arith.constant 0 : i32
    return %arg0, %c0_i32 : i32, i32
  }
  func.func @transform_6(%arg0: i32) -> (i32, i32) {
    %c0_i32 = arith.constant 0 : i32
    %c0_i32_0 = arith.constant 0 : i32
    return %arg0, %c0_i32 : i32, i32
  }
}

</mosaic_0001>

<bundles_post_ra>
// kernel: tofr_forward.2
= control target key start
LH: loop header
LB: loop body
LE: loop exit
PB: predicated region body
PF: predicated region fallthrough
CT: control target
= control target key end

     0   :  { %s1705_s22 = smov 0   ;;  %s2471_s0 = inlined_call_operand.vmem [shape: f32[2,16,256], index: 0, kind: input, shape index: {}]   ;;  %s2472_s1 = inlined_call_operand.vmem [shape: f32[32,16], index: 1, kind: input, shape index: {}]   ;;  %s2473_s2 = inlined_call_operand.vmem [shape: f32[32,1], index: 2, kind: input, shape index: {}]   ;;  %s2474_s3 = inlined_call_operand.<no memory space> [shape: f32[1,1], index: 3, kind: input, shape index: {}]   ;;  %s2475_s4 = inlined_call_operand.<no memory space> [shape: f32[1,1], index: 4, kind: input, shape index: {}]   ;;  %s2476_s5 = inlined_call_operand.vmem [shape: f32[2,16,256], index: 5, kind: output, shape index: {}]  }
   0x1   :  { %10 = sst [smem:[#allocation2]] %s2474_s3 }
   0x2   :  { %11 = sst [smem:[#allocation3]] %s2475_s4 }
   0x3 LB: > { %s1388_s23 = sadd.s32 4294967295, %s1666_s22   ;;  %p1392_p0 = scmp.ge.s32.totalorder %s1666_s22, 1  ;;  %s1666_s22 = sphi %s1705_s22, %s17_s22  }
   0x4   : > { %p189_p1 = scmp.lt.s32.totalorder %s1666_s22, 3 }
   0x6   : > { %p190_p2 = pnand %p1392_p0, %p189_p1 }
   0x8   : > { %193 = sbr.rel (%p190_p2) target bundleno = 1780 (0x6f4), region = 40 }
   0xd   : > { %p217_p3 = scmp.lt.s32.totalorder %s1388_s23, 1  ;;  %v238_v0 = vld [vmem:[%s2473_s2] sm:$0xff]  ;;  %v1668_v1 = vmov 0   ;;  %vm262_vm0 = vcmask 130048   ;;  %v239_v7 = vld [vmem:[%s2473_s2 + $0x8] sm:$0xff]  ;;  %vm410_vm1 = vcmask 1043456  }
   0xe   : > { %1454 = vset.pattern.permute.xlu0 %v1668_v1  ;;  %1455 = vset.pattern.permute.xlu2 %v1668_v1  ;;  %v234_v6 = vld [vmem:[%s2472_s1] sm:$0xff]  ;;  %v235_v8 = vld [vmem:[%s2472_s1 + $0x8] sm:$0xff]  ;;  %vm361_vm2 = vcmask 64512   ;;  %s232_s17 = sld [smem:[#allocation2]] }
   0xf   : > { %s2569_s23 = smov (!%p217_p3, %s1388_s23), 1  ;;  %244 = vperm.xlu0 %1454, %v238_v0   ;;  %s233_s18 = sld [smem:[#allocation3]] }
  0x10   : > { %s1443_s4 = sshll.u32 %s2569_s23, 5 }
  0x11   : > { %s1724_s27 = scalar_lea.vmem %s2471_s0, %s1443_s4  ;;  %s226_s21 = scalar_lea.vmem %s2476_s5, %s1443_s4 }
  0x12   : > { %v230_v2 = vld [vmem:[%s1724_s27 + $0x10] sm:$0xff]  ;;  %v231_v3 = vld [vmem:[%s1724_s27 + $0x18] sm:$0xff]  ;;  %v228_v4 = vld [vmem:[%s1724_s27] sm:$0xff] }
  0x13   : > { %289 = vmatpush.msra.mxu0 %v230_v2  ;;  %318 = vmatpush.msra.mxu1 %v231_v3  ;;  %v229_v5 = vld [vmem:[%s1724_s27 + $0x8] sm:$0xff] }
  0x15   : > { %290 = vmatpush.msra.mxu0 %v228_v4  ;;  %319 = vmatpush.msra.mxu1 %v229_v5 }
  0x16   : > { %1397 = vmatmul.msk.f32.vlgmr.msra.gmra.mxu0 %vm262_vm0, %v234_v6  ;;  %1401 = vmatmul.msk.f32.vlgmr.msra.gmra.mxu1 %vm262_vm0, %v234_v6 }
  0x17   : > { %249 = vperm.xlu0 %1454, %v239_v7  }
  0x1e   : > { %1398 = vmatmul.msk.f32.gmra.mxu0 %vm262_vm0, %v235_v8  ;;  %1402 = vmatmul.msk.f32.gmra.mxu1 %vm262_vm0, %v235_v8 }
  0x81   : > { %v245_v9 = vpop.permute.xlu0 %244 }
  0x89   : > { %v250_v16 = vpop.permute.xlu0 %249 }
  0x93   : > { %v292_v10 = vpop.f32.mrf.mxu0  ;;  %v321_v11 = vpop.f32.mrf.mxu1 }
  0x94   : > { %v293_v12 = vadd.f32 %v292_v10, %v245_v9  ;;  %v322_v13 = vadd.f32 %v321_v11, %v245_v9 }
  0x96   : > { %v333_v14 = vpack.c.bf16 %v293_v12, %v293_v12  ;;  %v334_v15 = vpack.c.bf16 %v322_v13, %v322_v13 }
  0x98   : > { %337 = vxpose.binary.xlu1.c.b16.start.end [1/2] (short) %v334_v15, %v333_v14, 128 }
  0x9b   : > { %v295_v17 = vpop.f32.mrf.mxu0  ;;  %v324_v18 = vpop.f32.mrf.mxu1 }
  0x9c   : > { %v296_v19 = vadd.f32 %v295_v17, %v250_v16  ;;  %v325_v20 = vadd.f32 %v324_v18, %v250_v16 }
  0x9e   : > { %v335_v21 = vpack.c.bf16 %v296_v19, %v296_v19  ;;  %v336_v22 = vpack.c.bf16 %v325_v20, %v325_v20 }
  0xa0   : > { %v412_v23 = vsel %vm410_vm1, %v335_v21, 0  ;;  %v415_v24 = vsel %vm410_vm1, %v336_v22, 0 }
  0xa1   : > { %424 = vmatpush.bf16.msra.mxu2 %v412_v23  ;;  %513 = vmatpush.bf16.msra.mxu3 %v415_v24 }
 0x144   : > { %v345_v25 = vpop.trf.xlu1 }
 0x145   : > { %1405 = vmatmul.msk.bf16.vlgmr.msra.gmra.mxu2 %vm361_vm2, %v345_v25  ;;  %1421 = vmatmul.msk.bf16.vlgmr.msra.gmra.mxu3 %vm361_vm2, %v345_v25 }
 0x14c   : > { %v346_v26 = vpop.trf.xlu1 }
 0x154   : > { %v347_v27 = vpop.trf.xlu1 }
 0x155   : > { %1406 = vmatmul.msk.bf16.gmra.mxu2 %vm361_vm2, %v347_v27  ;;  %1422 = vmatmul.msk.bf16.gmra.mxu3 %vm361_vm2, %v347_v27 }
 0x15c   : > { %v348_v28 = vpop.trf.xlu1 }
 0x164   : > { %v349_v29 = vpop.trf.xlu1 }
 0x165   : > { %1407 = vmatmul.msk.bf16.gmra.mxu2 %vm361_vm2, %v349_v29  ;;  %1423 = vmatmul.msk.bf16.gmra.mxu3 %vm361_vm2, %v349_v29 }
 0x16c   : > { %v350_v30 = vpop.trf.xlu1 }
 0x174   : > { %v351_v31 = vpop.trf.xlu1 }
 0x175   : > { %1408 = vmatmul.msk.bf16.gmra.mxu2 %vm361_vm2, %v351_v31  ;;  %1424 = vmatmul.msk.bf16.gmra.mxu3 %vm361_vm2, %v351_v31 }
 0x17c   : > { %v352_v32 = vpop.trf.xlu1 }
 0x184   : > { %v353_v33 = vpop.trf.xlu1 }
 0x185   : > { %1409 = vmatmul.msk.bf16.gmra.mxu2 %vm361_vm2, %v353_v33  ;;  %1425 = vmatmul.msk.bf16.gmra.mxu3 %vm361_vm2, %v353_v33 }
 0x18c   : > { %v354_v34 = vpop.trf.xlu1 }
 0x194   : > { %v355_v35 = vpop.trf.xlu1 }
 0x195   : > { %1410 = vmatmul.msk.bf16.gmra.mxu2 %vm361_vm2, %v355_v35  ;;  %1426 = vmatmul.msk.bf16.gmra.mxu3 %vm361_vm2, %v355_v35 }
 0x19c   : > { %v356_v36 = vpop.trf.xlu1 }
 0x1a4   : > { %v357_v37 = vpop.trf.xlu1 }
 0x1a5   : > { %1411 = vmatmul.msk.bf16.gmra.mxu2 %vm361_vm2, %v357_v37  ;;  %1427 = vmatmul.msk.bf16.gmra.mxu3 %vm361_vm2, %v357_v37 }
 0x1ac   : > { %v358_v38 = vpop.trf.xlu1 }
 0x1b4   : > { %v359_v39 = vpop.trf.xlu1 }
 0x1b5   : > { %1412 = vmatmul.msk.bf16.gmra.mxu2 %vm361_vm2, %v359_v39  ;;  %1428 = vmatmul.msk.bf16.gmra.mxu3 %vm361_vm2, %v359_v39 }
 0x1bc   : > { %v360_v16 = vpop.trf.xlu1 }
 0x1c5   : > { %1413 = vmatmul.msk.bf16.gmra.mxu2 %vm361_vm2, %v346_v26  ;;  %1429 = vmatmul.msk.bf16.gmra.mxu3 %vm361_vm2, %v346_v26 }
 0x1c8   : > { %v1761_v40 = vpop.f32.mrf.mxu2  ;;  %v1763_v41 = vpop.f32.mrf.mxu3 }
 0x1c9   : > { %2506 = vst [vmem:[#allocation4_spill] sm:$0xff] %v1761_v40  ;;  %v595_v24 = vmax.f32 %v1761_v40, %v1763_v41 }
 0x1ca   : > { %2507 = vst [vmem:[#allocation5_spill] sm:$0xff] %v1763_v41 }
 0x1d0   : > { %v1765_v42 = vpop.f32.mrf.mxu2  ;;  %v1767_v43 = vpop.f32.mrf.mxu3 }
 0x1d1   : > { %2508 = vst [vmem:[#allocation6_spill] sm:$0xff] %v1767_v43  ;;  %v598_v35 = vmax.f32 %v1765_v42, %v1767_v43 }
 0x1d5   : > { %1414 = vmatmul.msk.bf16.gmra.mxu2 %vm361_vm2, %v348_v28  ;;  %1430 = vmatmul.msk.bf16.gmra.mxu3 %vm361_vm2, %v348_v28 }
 0x1d8   : > { %v1771_v44 = vpop.f32.mrf.mxu2  ;;  %v1773_v45 = vpop.f32.mrf.mxu3 }
 0x1d9   : > { %v601_v20 = vmax.f32 %v1771_v44, %v1773_v45 }
 0x1e0   : > { %v1775_v46 = vpop.f32.mrf.mxu2  ;;  %v1777_v47 = vpop.f32.mrf.mxu3 }
 0x1e1   : > { %v604_v31 = vmax.f32 %v1775_v46, %v1777_v47 }
 0x1e5   : > { %1415 = vmatmul.msk.bf16.gmra.mxu2 %vm361_vm2, %v350_v30  ;;  %1431 = vmatmul.msk.bf16.gmra.mxu3 %vm361_vm2, %v350_v30 }
 0x1e8   : > { %v1781_v48 = vpop.f32.mrf.mxu2  ;;  %v1783_v49 = vpop.f32.mrf.mxu3 }
 0x1e9   : > { %v607_v15 = vmax.f32 %v1781_v48, %v1783_v49 }
 0x1f0   : > { %v1785_v50 = vpop.f32.mrf.mxu2  ;;  %v1787_v51 = vpop.f32.mrf.mxu3 }
 0x1f1   : > { %v610_v27 = vmax.f32 %v1785_v50, %v1787_v51 }
 0x1f5   : > { %1416 = vmatmul.msk.bf16.gmra.mxu2 %vm361_vm2, %v352_v32  ;;  %1432 = vmatmul.msk.bf16.gmra.mxu3 %vm361_vm2, %v352_v32 }
 0x1f8   : > { %v1791_v52 = vpop.f32.mrf.mxu2  ;;  %v1793_v53 = vpop.f32.mrf.mxu3 }
 0x1f9   : > { %v613_v10 = vmax.f32 %v1791_v52, %v1793_v53 }
 0x200   : > { %v1795_v54 = vpop.f32.mrf.mxu2  ;;  %v1797_v55 = vpop.f32.mrf.mxu3 }
 0x201   : > { %v616_v23 = vmax.f32 %v1795_v54, %v1797_v55 }
 0x205   : > { %1417 = vmatmul.msk.bf16.gmra.mxu2 %vm361_vm2, %v354_v34  ;;  %1433 = vmatmul.msk.bf16.gmra.mxu3 %vm361_vm2, %v354_v34 }
 0x208   : > { %v1801_v56 = vpop.f32.mrf.mxu2  ;;  %v1803_v57 = vpop.f32.mrf.mxu3 }
 0x209   : > { %v619_v14 = vmax.f32 %v1801_v56, %v1803_v57 }
 0x210   : > { %v1805_v58 = vpop.f32.mrf.mxu2  ;;  %v1807_v59 = vpop.f32.mrf.mxu3 }
 0x211   : > { %v622_v19 = vmax.f32 %v1805_v58, %v1807_v59 }
 0x215   : > { %1418 = vmatmul.msk.bf16.gmra.mxu2 %vm361_vm2, %v356_v36  ;;  %1434 = vmatmul.msk.bf16.gmra.mxu3 %vm361_vm2, %v356_v36 }
 0x218   : > { %v1811_v60 = vpop.f32.mrf.mxu2  ;;  %v1813_v61 = vpop.f32.mrf.mxu3 }
 0x219   : > { %v625_v5 = vmax.f32 %v1811_v60, %v1813_v61 }
 0x220   : > { %v1815_v62 = vpop.f32.mrf.mxu2  ;;  %v1817_v63 = vpop.f32.mrf.mxu3 }
 0x221   : > { %v628_v9 = vmax.f32 %v1815_v62, %v1817_v63 }
 0x225   : > { %1419 = vmatmul.msk.bf16.gmra.mxu2 %vm361_vm2, %v358_v38  ;;  %1435 = vmatmul.msk.bf16.gmra.mxu3 %vm361_vm2, %v358_v38 }
 0x228   : > { %v1821_v0 = vpop.f32.mrf.mxu2  ;;  %v1823_v1 = vpop.f32.mrf.mxu3 }
 0x229   : > { %v631_v2 = vmax.f32 %v1821_v0, %v1823_v1 }
 0x22b   : > { %632 = vmax.xlane.f32.xlu2 %v631_v2 }
 0x230   : > { %v1827_v3 = vpop.f32.mrf.mxu2  ;;  %v1829_v4 = vpop.f32.mrf.mxu3 }
 0x231   : > { %v634_v6 = vmax.f32 %v1827_v3, %v1829_v4 }
 0x233   : > { %626 = vmax.xlane.f32.xlu2 %v625_v5  ;;  %635 = vmax.xlane.f32.xlu0 %v634_v6 }
 0x235   : > { %1420 = vmatmul.msk.bf16.gmra.mxu2 %vm361_vm2, %v360_v16  ;;  %1436 = vmatmul.msk.bf16.gmra.mxu3 %vm361_vm2, %v360_v16 }
 0x238   : > { %v1835_v7 = vpop.f32.mrf.mxu2  ;;  %v1837_v8 = vpop.f32.mrf.mxu3 }
 0x239   : > { %v637_v11 = vmax.f32 %v1835_v7, %v1837_v8 }
 0x23b   : > { %629 = vmax.xlane.f32.xlu2 %v628_v9  ;;  %614 = vmax.xlane.f32.xlu0 %v613_v10 }
 0x23c   : > { %638 = vmax.xlane.f32.xlu1 %v637_v11 }
 0x240   : > { %v1845_v12 = vpop.f32.mrf.mxu2  ;;  %v1847_v13 = vpop.f32.mrf.mxu3 }
 0x241   : > { %v640_v39 = vmax.f32 %v1845_v12, %v1847_v13 }
 0x243   : > { %620 = vmax.xlane.f32.xlu2 %v619_v14  ;;  %608 = vmax.xlane.f32.xlu0 %v607_v15 }
 0x248   : > { %v1855_v17 = vpop.f32.mrf.mxu2  ;;  %v1857_v18 = vpop.f32.mrf.mxu3 }
 0x249   : > { %v643_v28 = vmax.f32 %v1855_v17, %v1857_v18 }
 0x24b   : > { %623 = vmax.xlane.f32.xlu2 %v622_v19  ;;  %602 = vmax.xlane.f32.xlu0 %v601_v20 }
 0x250   : > { %v1863_v21 = vpop.f32.mrf.mxu2  ;;  %v1865_v22 = vpop.f32.mrf.mxu3 }
 0x251   : > { %v646_v6 = vmax.f32 %v1863_v21, %v1865_v22 }
 0x253   : > { %617 = vmax.xlane.f32.xlu2 %v616_v23  ;;  %596 = vmax.xlane.f32.xlu0 %v595_v24 }
 0x258   : > { %v1871_v25 = vpop.f32.mrf.mxu2  ;;  %v1873_v26 = vpop.f32.mrf.mxu3 }
 0x259   : > { %2509 = vst [vmem:[#allocation7_spill] sm:$0xff] %v1871_v25  ;;  %v649_v32 = vmax.f32 %v1871_v25, %v1873_v26 }
 0x25a   : > { %2510 = vst [vmem:[#allocation8_spill] sm:$0xff] %v1873_v26 }
 0x25b   : > { %611 = vmax.xlane.f32.xlu2 %v610_v27  ;;  %644 = vmax.xlane.f32.xlu0 %v643_v28 }
 0x260   : > { %v1879_v29 = vpop.f32.mrf.mxu2  ;;  %v1881_v30 = vpop.f32.mrf.mxu3 }
 0x261   : > { %v652_v10 = vmax.f32 %v1879_v29, %v1881_v30 }
 0x263   : > { %605 = vmax.xlane.f32.xlu2 %v604_v31  ;;  %650 = vmax.xlane.f32.xlu0 %v649_v32 }
 0x268   : > { %v1887_v33 = vpop.f32.mrf.mxu2  ;;  %v1889_v34 = vpop.f32.mrf.mxu3 }
 0x269   : > { %v655_v36 = vmax.f32 %v1887_v33, %v1889_v34 }
 0x26b   : > { %599 = vmax.xlane.f32.xlu2 %v598_v35  ;;  %656 = vmax.xlane.f32.xlu0 %v655_v36 }
 0x270   : > { %v1895_v37 = vpop.f32.mrf.mxu2  ;;  %v1897_v38 = vpop.f32.mrf.mxu3 }
 0x271   : > { %2511 = vst [vmem:[#allocation9_spill] sm:$0xff] %v1895_v37  ;;  %v658_v15 = vmax.f32 %v1895_v37, %v1897_v38 }
 0x272   : > { %2512 = vst [vmem:[#allocation10_spill] sm:$0xff] %v1897_v38 }
 0x273   : > { %641 = vmax.xlane.f32.xlu2 %v640_v39 }
 0x278   : > { %v1901_v2 = vpop.f32.mrf.mxu2  ;;  %v1903_v5 = vpop.f32.mrf.mxu3 }
 0x279   : > { %v661_v9 = vmax.f32 %v1901_v2, %v1903_v5 }
 0x27b   : > { %647 = vmax.xlane.f32.xlu2 %v646_v6  ;;  %662 = vmax.xlane.f32.xlu0 %v661_v9 }
 0x280   : > { %v1911_v11 = vpop.f32.mrf.mxu2  ;;  %v1913_v14 = vpop.f32.mrf.mxu3 }
 0x281   : > { %v664_v20 = vmax.f32 %v1911_v11, %v1913_v14 }
 0x283   : > { %653 = vmax.xlane.f32.xlu2 %v652_v10 }
 0x288   : > { %v1917_v16 = vpop.f32.mrf.mxu2  ;;  %v1919_v19 = vpop.f32.mrf.mxu3 }
 0x28b   : > { %659 = vmax.xlane.f32.xlu2 %v658_v15 }
 0x290   : > { %v1923_v23 = vpop.f32.mrf.mxu2  ;;  %v1925_v24 = vpop.f32.mrf.mxu3 }
 0x291   : > { %v670_v27 = vmax.f32 %v1923_v23, %v1925_v24 }
 0x293   : > { %665 = vmax.xlane.f32.xlu2 %v664_v20 }
 0x29b   : > { %671 = vmax.xlane.f32.xlu2 %v670_v27 }
 0x29e   : > { %v1929_v28 = vpop.xlane.xlu2 %632 }
 0x2a6   : > { %v627_v31 = vpop.xlane.xlu2 %626  ;;  %v1931_v32 = vpop.xlane.xlu0 %635 }
 0x2ae   : > { %v630_v35 = vpop.xlane.xlu2 %629  ;;  %v615_v36 = vpop.xlane.xlu0 %614 }
 0x2af   : > { %v703_v39 = vsub.f32 %v1791_v52, %v615_v36  ;;  %v704_v6 = vsub.f32 %v1793_v53, %v615_v36 }
 0x2b1   : > { %v779_v9 = vmul.f32 1.442695, %v703_v39  ;;  %v781_v10 = vmul.f32 1.442695, %v704_v6 }
 0x2b3   : > { %1456 = vpow2.f32 %v779_v9 }
 0x2b4   : > { %1458 = vpow2.f32 %v781_v10  ;;  %v1947_v10 = vpop.f32.mrf.mxu2 }
 0x2b6   : > { %v621_v15 = vpop.xlane.xlu2 %620  ;;  %v1935_v20 = vpop.xlane.xlu0 %608 }
 0x2b7   : > { %v707_v27 = vsub.f32 %v1801_v56, %v621_v15  ;;  %v708_v38 = vsub.f32 %v1803_v57, %v621_v15  ;;  %v1949_v15 = vpop.f32.mrf.mxu3 }
 0x2b9   : > { %v1939_v37 = vpop.eup %1456  ;;  %v787_v25 = vmul.f32 1.442695, %v707_v27  ;;  %v789_v53 = vmul.f32 1.442695, %v708_v38  ;;  %v667_v38 = vmax.f32 %v1917_v16, %v1919_v19 }
 0x2ba   : > { %2513 = vst [vmem:[#allocation11_spill] sm:$0xff] %v1939_v37  ;;  %v1941_v26 = vpop.eup %1458 }
 0x2bb   : > { %2514 = vst [vmem:[#allocation12_spill] sm:$0xff] %v1941_v26  ;;  %v901_v52 = vadd.f32 %v1941_v26, %v1939_v37  ;;  %1460 = vpow2.f32 %v787_v25  ;;  %v712_v25 = vsub.f32 %v1813_v61, %v627_v31 }
 0x2bc   : > { %1462 = vpow2.f32 %v789_v53  ;;  %v713_v53 = vsub.f32 %v1815_v62, %v630_v35 }
 0x2bd   : > { %902 = vadd.xlane.f32.xlu0 %v901_v52  ;;  %v797_v37 = vmul.f32 1.442695, %v712_v25 }
 0x2be   : > { %v624_v36 = vpop.xlane.xlu2 %623  ;;  %v603_v9 = vpop.xlane.xlu0 %602  ;;  %v799_v61 = vmul.f32 1.442695, %v713_v53 }
 0x2bf   : > { %v709_v39 = vsub.f32 %v1805_v58, %v624_v36  ;;  %v710_v6 = vsub.f32 %v1807_v59, %v624_v36  ;;  %v711_v58 = vsub.f32 %v1811_v60, %v627_v31  ;;  %v696_v25 = vsub.f32 %v1773_v45, %v603_v9 }
 0x2c1   : > { %v791_v56 = vmul.f32 1.442695, %v709_v39  ;;  %v793_v57 = vmul.f32 1.442695, %v710_v6  ;;  %v1955_v52 = vpop.eup %1460  ;;  %v714_v6 = vsub.f32 %v1817_v63, %v630_v35  ;;  %v795_v26 = vmul.f32 1.442695, %v711_v58 }
 0x2c2   : > { %v1958_v59 = vpop.eup %1462  ;;  %v695_v58 = vsub.f32 %v1771_v44, %v603_v9  ;;  %v673_v44 = vmax.f32 %v1947_v10, %v1949_v15 }
 0x2c3   : > { %1464 = vpow2.f32 %v791_v56  ;;  %v907_v31 = vadd.f32 %v1958_v59, %v1955_v52  ;;  %v801_v62 = vmul.f32 1.442695, %v714_v6 }
 0x2c4   : > { %1466 = vpow2.f32 %v793_v57  ;;  %v1969_v57 = vpop.f32.mrf.mxu2 }
 0x2c5   : > { %668 = vmax.xlane.f32.xlu0 %v667_v38  ;;  %v1973_v38 = vpop.f32.mrf.mxu3  ;;  %1468 = vpow2.f32 %v795_v26 }
 0x2c6   : > { %v1953_v27 = vpop.xlane.xlu2 %617  ;;  %v1967_v56 = vpop.xlane.xlu0 %596  ;;  %1470 = vpow2.f32 %v797_v37  ;;  %v676_v53 = vmax.f32 %v1969_v57, %v1973_v38 }
 0x2c7   : > { %2515 = vst [vmem:[#allocation13_spill] sm:$0xff] %v1967_v56  ;;  %1472 = vpow2.f32 %v799_v61  ;;  %v717_v61 = vsub.f32 %v1827_v3, %v1931_v32 }
 0x2c8   : > { %1474 = vpow2.f32 %v801_v62  ;;  %v718_v62 = vsub.f32 %v1829_v4, %v1931_v32 }
 0x2c9   : > { %v1961_v36 = vpop.eup %1464  ;;  %v807_v3 = vmul.f32 1.442695, %v717_v61 }
 0x2ca   : > { %v1964_v39 = vpop.eup %1466  ;;  %v809_v4 = vmul.f32 1.442695, %v718_v62 }
 0x2cb   : > { %v910_v60 = vadd.f32 %v1964_v39, %v1961_v36  ;;  %v1985_v6 = vpop.eup %1468 }
 0x2cd   : > { %911 = vadd.xlane.f32.xlu2 %v910_v60  ;;  %908 = vadd.xlane.f32.xlu0 %v907_v31  ;;  %v1993_v37 = vpop.f32.mrf.mxu3 }
 0x2ce   : > { %v612_v41 = vpop.xlane.xlu2 %611  ;;  %v1983_v26 = vpop.xlane.xlu0 %644 }
 0x2cf   : > { %v701_v63 = vsub.f32 %v1785_v50, %v612_v41  ;;  %v702_v35 = vsub.f32 %v1787_v51, %v612_v41  ;;  %v1987_v50 = vpop.f32.mrf.mxu2  ;;  %v763_v41 = vmul.f32 1.442695, %v695_v58  ;;  %v1991_v51 = vpop.eup %1470 }
 0x2d0   : > { %v1997_v9 = vpop.eup %1472 }
 0x2d1   : > { %v775_v40 = vmul.f32 1.442695, %v701_v63  ;;  %v777_v56 = vmul.f32 1.442695, %v702_v35  ;;  %v715_v63 = vsub.f32 %v1821_v0, %v1929_v28 }
 0x2d3   : > { %1476 = vpow2.f32 %v775_v40  ;;  %v765_v40 = vmul.f32 1.442695, %v696_v25  ;;  %v716_v25 = vsub.f32 %v1823_v1, %v1929_v28 }
 0x2d4   : > { %1478 = vpow2.f32 %v777_v56  ;;  %v1999_v56 = vpop.eup %1474 }
 0x2d5   : > { %677 = vmax.xlane.f32.xlu2 %v676_v53  ;;  %674 = vmax.xlane.f32.xlu0 %v673_v44  ;;  %1480 = vpow2.f32 %v763_v41  ;;  %v916_v58 = vadd.f32 %v1999_v56, %v1997_v9  ;;  %v913_v53 = vadd.f32 %v1991_v51, %v1985_v6  ;;  %v803_v44 = vmul.f32 1.442695, %v715_v63  ;;  %v2029_v28 = vpop.f32.mrf.mxu3 }
 0x2d6   : > { %v1995_v45 = vpop.xlane.xlu2 %605  ;;  %1482 = vpow2.f32 %v765_v40  ;;  %v2019_v32 = vpop.xlane.xlu0 %650 }
 0x2d7   : > { %2518 = vst [vmem:[#allocation16_spill] sm:$0xff] %v2019_v32  ;;  %v639_v40 = vpop.xlane.xlu1 %638  ;;  %v2027_v1 = vpop.f32.mrf.mxu2  ;;  %1484 = vpow2.f32 %v807_v3 }
 0x2d8   : > { %1486 = vpow2.f32 %v809_v4  ;;  %v719_v61 = vsub.f32 %v1835_v7, %v639_v40  ;;  %v682_v63 = vmax.f32 %v2027_v1, %v2029_v28 }
 0x2d9   : > { %v2001_v60 = vpop.eup %1476  ;;  %1488 = vpow2.f32 %v803_v44 }
 0x2da   : > { %2516 = vst [vmem:[#allocation14_spill] sm:$0xff] %v2001_v60  ;;  %v2005_v31 = vpop.eup %1478 }
 0x2db   : > { %2517 = vst [vmem:[#allocation15_spill] sm:$0xff] %v2005_v31  ;;  %v898_v35 = vadd.f32 %v2005_v31, %v2001_v60  ;;  %v2023_v0 = vpop.eup %1480  ;;  %v805_v60 = vmul.f32 1.442695, %v716_v25 }
 0x2dc   : > { %2519 = vst [vmem:[#allocation17_spill] sm:$0xff] %v2023_v0  ;;  %v2025_v31 = vpop.eup %1482 }
 0x2dd   : > { %899 = vadd.xlane.f32.xlu1 %v898_v35  ;;  %917 = vadd.xlane.f32.xlu2 %v916_v58  ;;  %2520 = vst [vmem:[#allocation18_spill] sm:$0xff] %v2025_v31  ;;  %v889_v62 = vadd.f32 %v2025_v31, %v2023_v0  ;;  %1490 = vpow2.f32 %v805_v60  ;;  %v720_v35 = vsub.f32 %v1837_v8, %v639_v40  ;;  %v2041_v3 = vpop.eup %1484 }
 0x2de   : > { %v2021_v41 = vpop.xlane.xlu2 %599  ;;  %914 = vadd.xlane.f32.xlu0 %v913_v53  ;;  %v679_v58 = vmax.f32 %v1987_v50, %v1993_v37  ;;  %2521 = vst [vmem:[#allocation19_spill] sm:$0xff] %v2041_v3  ;;  %v811_v53 = vmul.f32 1.442695, %v719_v61  ;;  %v2043_v7 = vpop.eup %1486  ;;  %v699_v8 = vsub.f32 %v1781_v48, %v1935_v20  ;;  %v700_v61 = vsub.f32 %v1783_v49, %v1935_v20 }
 0x2df   : > { %2522 = vst [vmem:[#allocation20_spill] sm:$0xff] %v2043_v7  ;;  %v813_v4 = vmul.f32 1.442695, %v720_v35  ;;  %v2045_v44 = vpop.xlane.xlu0 %656  ;;  %v2047_v31 = vpop.eup %1488  ;;  %v922_v40 = vadd.f32 %v2043_v7, %v2041_v3 }
 0x2e0   : > { %2523 = vst [vmem:[#allocation21_spill] sm:$0xff] %v2047_v31  ;;  %1492 = vpow2.f32 %v811_v53  ;;  %v2061_v35 = vpop.f32.mrf.mxu3  ;;  %v771_v53 = vmul.f32 1.442695, %v699_v8  ;;  %v773_v48 = vmul.f32 1.442695, %v700_v61 }
 0x2e1   : > { %1494 = vpow2.f32 %v813_v4  ;;  %v705_v4 = vsub.f32 %v1795_v54, %v1953_v27 }
 0x2e2   : > { %1496 = vpow2.f32 %v771_v53 }
 0x2e3   : > { %v2049_v60 = vpop.eup %1490  ;;  %1498 = vpow2.f32 %v773_v48  ;;  %v783_v61 = vmul.f32 1.442695, %v705_v4 }
 0x2e4   : > { %2524 = vst [vmem:[#allocation22_spill] sm:$0xff] %v2049_v60 }
 0x2e5   : > { %890 = vadd.xlane.f32.xlu1 %v889_v62  ;;  %683 = vmax.xlane.f32.xlu2 %v682_v63  ;;  %v2057_v62 = vpop.f32.mrf.mxu2  ;;  %v919_v63 = vadd.f32 %v2049_v60, %v2047_v31  ;;  %1500 = vpow2.f32 %v783_v61 }
 0x2e6   : > { %v2039_v25 = vpop.xlane.xlu2 %641  ;;  %680 = vmax.xlane.f32.xlu0 %v679_v58  ;;  %v2065_v32 = vpop.eup %1492  ;;  %v685_v49 = vmax.f32 %v2057_v62, %v2061_v35 }
 0x2e7   : > { %v2071_v20 = vpop.eup %1494 }
 0x2ed   : > { %923 = vadd.xlane.f32.xlu2 %v922_v40  ;;  %v706_v40 = vsub.f32 %v1797_v55, %v1953_v27  ;;  %v2081_v43 = vpop.f32.mrf.mxu2  ;;  %v2083_v55 = vpop.f32.mrf.mxu3 }
 0x2ee   : > { %v2063_v58 = vpop.xlane.xlu2 %647  ;;  %920 = vadd.xlane.f32.xlu0 %v919_v63  ;;  %v663_v0 = vpop.xlane.xlu0 %662  ;;  %v925_v63 = vadd.f32 %v2071_v20, %v2065_v32 }
 0x2ef   : > { %v735_v7 = vsub.f32 %v1901_v2, %v663_v0  ;;  %v736_v8 = vsub.f32 %v1903_v5, %v663_v0  ;;  %v785_v54 = vmul.f32 1.442695, %v706_v40  ;;  %v2085_v27 = vpop.eup %1496  ;;  %v697_v2 = vsub.f32 %v1775_v46, %v1995_v45 }
 0x2f0   : > { %v2089_v5 = vpop.eup %1498  ;;  %v698_v0 = vsub.f32 %v1777_v47, %v1995_v45  ;;  %v721_v47 = vsub.f32 %v1845_v12, %v2039_v25 }
 0x2f1   : > { %v843_v3 = vmul.f32 1.442695, %v735_v7  ;;  %v845_v31 = vmul.f32 1.442695, %v736_v8  ;;  %1502 = vpow2.f32 %v785_v54  ;;  %v688_v7 = vmax.f32 %v2081_v43, %v2083_v55  ;;  %v2099_v46 = vpop.eup %1500 }
 0x2f2   : > { %v767_v53 = vmul.f32 1.442695, %v697_v2  ;;  %v895_v48 = vadd.f32 %v2089_v5, %v2085_v27  ;;  %v769_v4 = vmul.f32 1.442695, %v698_v0  ;;  %v815_v61 = vmul.f32 1.442695, %v721_v47 }
 0x2f3   : > { %1504 = vpow2.f32 %v843_v3 }
 0x2f4   : > { %1506 = vpow2.f32 %v845_v31  ;;  %v722_v31 = vsub.f32 %v1847_v13, %v2039_v25  ;;  %v731_v13 = vsub.f32 %v1887_v33, %v2045_v44 }
 0x2f5   : > { %686 = vmax.xlane.f32.xlu2 %v685_v49  ;;  %1508 = vpow2.f32 %v767_v53 }
 0x2f6   : > { %v2079_v60 = vpop.xlane.xlu2 %653  ;;  %926 = vadd.xlane.f32.xlu0 %v925_v63  ;;  %1510 = vpow2.f32 %v769_v4  ;;  %v817_v54 = vmul.f32 1.442695, %v722_v31  ;;  %v732_v4 = vsub.f32 %v1889_v34, %v2045_v44 }
 0x2f7   : > { %v2101_v40 = vpop.eup %1502  ;;  %1512 = vpow2.f32 %v815_v61  ;;  %v729_v34 = vsub.f32 %v1879_v29, %v2079_v60 }
 0x2f8   : > { %v904_v3 = vadd.f32 %v2101_v40, %v2099_v46  ;;  %1514 = vpow2.f32 %v817_v54 }
 0x2f9   : > { %v2103_v8 = vpop.eup %1504 }
 0x2fa   : > { %v2107_v45 = vpop.eup %1506 }
 0x2fb   : > { %v949_v63 = vadd.f32 %v2107_v45, %v2103_v8  ;;  %v2115_v0 = vpop.eup %1508 }
 0x2fc   : > { %v2119_v53 = vpop.eup %1510 }
 0x2fd   : > { %689 = vmax.xlane.f32.xlu2 %v688_v7  ;;  %v892_v47 = vadd.f32 %v2119_v53, %v2115_v0 }
 0x2fe   : > { %v2097_v49 = vpop.xlane.xlu2 %659  ;;  %896 = vadd.xlane.f32.xlu0 %v895_v48 }
 0x305   : > { %905 = vadd.xlane.f32.xlu2 %v904_v3  ;;  %v2127_v3 = vpop.eup %1512 }
 0x306   : > { %v666_v2 = vpop.xlane.xlu2 %665  ;;  %950 = vadd.xlane.f32.xlu0 %v949_v63  ;;  %v2131_v63 = vpop.eup %1514 }
 0x307   : > { %v737_v12 = vsub.f32 %v1911_v11, %v666_v2  ;;  %v738_v7 = vsub.f32 %v1913_v14, %v666_v2  ;;  %v835_v11 = vmul.f32 1.442695, %v731_v13  ;;  %v837_v14 = vmul.f32 1.442695, %v732_v4 }
 0x308   : > { %v831_v13 = vmul.f32 1.442695, %v729_v34  ;;  %v725_v34 = vsub.f32 %v1863_v21, %v2063_v58 }
 0x309   : > { %v847_v25 = vmul.f32 1.442695, %v737_v12  ;;  %v849_v48 = vmul.f32 1.442695, %v738_v7  ;;  %v730_v7 = vsub.f32 %v1881_v30, %v2079_v60  ;;  %v723_v30 = vsub.f32 %v1855_v17, %v1983_v26 }
 0x30b   : > { %1516 = vpow2.f32 %v847_v25  ;;  %v833_v29 = vmul.f32 1.442695, %v730_v7 }
 0x30c   : > { %1518 = vpow2.f32 %v849_v48 }
 0x30d   : > { %893 = vadd.xlane.f32.xlu2 %v892_v47  ;;  %1520 = vpow2.f32 %v835_v11  ;;  %v724_v47 = vsub.f32 %v1857_v18, %v1983_v26  ;;  %v726_v18 = vsub.f32 %v1865_v22, %v2063_v58 }
 0x30e   : > { %v672_v31 = vpop.xlane.xlu2 %671  ;;  %1522 = vpow2.f32 %v837_v14 }
 0x30f   : > { %v741_v33 = vsub.f32 %v1923_v23, %v672_v31  ;;  %v742_v61 = vsub.f32 %v1925_v24, %v672_v31  ;;  %v928_v24 = vadd.f32 %v2131_v63, %v2127_v3  ;;  %v819_v31 = vmul.f32 1.442695, %v723_v30 }
 0x311   : > { %v2133_v2 = vpop.eup %1516  ;;  %v855_v44 = vmul.f32 1.442695, %v741_v33  ;;  %v857_v54 = vmul.f32 1.442695, %v742_v61  ;;  %v821_v33 = vmul.f32 1.442695, %v724_v47 }
 0x312   : > { %v2137_v12 = vpop.eup %1518 }
 0x313   : > { %1524 = vpow2.f32 %v855_v44  ;;  %v952_v23 = vadd.f32 %v2137_v12, %v2133_v2  ;;  %v2145_v25 = vpop.eup %1520  ;;  %v823_v44 = vmul.f32 1.442695, %v725_v34 }
 0x314   : > { %1526 = vpow2.f32 %v857_v54  ;;  %2525 = vst [vmem:[#allocation23_spill] sm:$0xff] %v2145_v25  ;;  %v2147_v48 = vpop.eup %1522  ;;  %v825_v54 = vmul.f32 1.442695, %v726_v18 }
 0x315   : > { %953 = vadd.xlane.f32.xlu1 %v952_v23  ;;  %929 = vadd.xlane.f32.xlu2 %v928_v24  ;;  %2526 = vst [vmem:[#allocation24_spill] sm:$0xff] %v2147_v48  ;;  %1528 = vpow2.f32 %v831_v13  ;;  %v943_v11 = vadd.f32 %v2147_v48, %v2145_v25  ;;  %v2546_v48 = vld [vmem:[#allocation22_spill] sm:$0xff]  ;;  %v2547_v25 = vld [vmem:[#allocation20_spill] sm:$0xff] }
 0x316   : > { %1530 = vpow2.f32 %v833_v29 }
 0x317   : > { %1532 = vpow2.f32 %v819_v31 }
 0x318   : > { %1534 = vpow2.f32 %v821_v33 }
 0x319   : > { %v2149_v4 = vpop.eup %1524  ;;  %1536 = vpow2.f32 %v823_v44 }
 0x31a   : > { %v2153_v60 = vpop.eup %1526  ;;  %1538 = vpow2.f32 %v825_v54 }
 0x31b   : > { %v958_v14 = vadd.f32 %v2153_v60, %v2149_v4  ;;  %v2161_v61 = vpop.eup %1528 }
 0x31c   : > { %2527 = vst [vmem:[#allocation25_spill] sm:$0xff] %v2161_v61  ;;  %v2163_v17 = vpop.eup %1530 }
 0x31d   : > { %944 = vadd.xlane.f32.xlu1 %v943_v11  ;;  %959 = vadd.xlane.f32.xlu0 %v958_v14  ;;  %2528 = vst [vmem:[#allocation26_spill] sm:$0xff] %v2163_v17  ;;  %v940_v26 = vadd.f32 %v2163_v17, %v2161_v61  ;;  %v2171_v7 = vpop.eup %1532 }
 0x31e   : > { %2529 = vst [vmem:[#allocation27_spill] sm:$0xff] %v2171_v7  ;;  %v2173_v23 = vpop.eup %1534 }
 0x31f   : > { %2530 = vst [vmem:[#allocation28_spill] sm:$0xff] %v2173_v23  ;;  %v931_v24 = vadd.f32 %v2173_v23, %v2171_v7  ;;  %v2177_v21 = vpop.eup %1536 }
 0x320   : > { %2531 = vst [vmem:[#allocation29_spill] sm:$0xff] %v2177_v21  ;;  %v2179_v13 = vpop.eup %1538 }
 0x321   : > { %2532 = vst [vmem:[#allocation30_spill] sm:$0xff] %v2179_v13  ;;  %v934_v58 = vadd.f32 %v2179_v13, %v2177_v21 }
 0x325   : > { %941 = vadd.xlane.f32.xlu1 %v940_v26 }
 0x32d   : > { %932 = vadd.xlane.f32.xlu1 %v931_v24 }
 0x330   : > { %v2181_v22 = vpop.xlane.xlu0 %902 }
 0x335   : > { %935 = vadd.xlane.f32.xlu1 %v934_v58 }
 0x338   : > { %v669_v29 = vpop.xlane.xlu0 %668 }
 0x339   : > { %v739_v30 = vsub.f32 %v1917_v16, %v669_v29  ;;  %v740_v47 = vsub.f32 %v1919_v19, %v669_v29 }
 0x33b   : > { %v851_v11 = vmul.f32 1.442695, %v739_v30  ;;  %v853_v14 = vmul.f32 1.442695, %v740_v47 }
 0x33d   : > { %1540 = vpow2.f32 %v851_v11 }
 0x33e   : > { %1542 = vpow2.f32 %v853_v14 }
 0x340   : > { %v912_v31 = vpop.xlane.xlu2 %911  ;;  %v909_v33 = vpop.xlane.xlu0 %908 }
 0x341   : > { %1544 = vrcp.f32 %v912_v31 }
 0x342   : > { %1546 = vrcp.f32 %v909_v33 }
 0x343   : > { %v2187_v34 = vpop.eup %1540 }
 0x344   : > { %v2189_v18 = vpop.eup %1542 }
 0x345   : > { %v955_v44 = vadd.f32 %v2189_v18, %v2187_v34 }
 0x347   : > { %v1545_v26 = vpop.eup %1544  ;;  %956 = vadd.xlane.f32.xlu2 %v955_v44 }
 0x348   : > { %v678_v54 = vpop.xlane.xlu2 %677  ;;  %v2194_v16 = vmul.f32 %v1545_v26, %v1961_v36  ;;  %v2197_v19 = vmul.f32 %v1545_v26, %v1964_v39  ;;  %v1547_v24 = vpop.eup %1546 }
 0x349   : > { %v745_v58 = vsub.f32 %v1969_v57, %v678_v54  ;;  %v746_v29 = vsub.f32 %v1973_v38, %v678_v54  ;;  %v675_v30 = vpop.xlane.xlu0 %674  ;;  %v2202_v47 = vmul.f32 %v1547_v24, %v1955_v52  ;;  %v2205_v11 = vmul.f32 %v1547_v24, %v1958_v59 }
 0x34a   : > { %v743_v14 = vsub.f32 %v1947_v10, %v675_v30  ;;  %v744_v36 = vsub.f32 %v1949_v15, %v675_v30 }
 0x34b   : > { %v863_v31 = vmul.f32 1.442695, %v745_v58  ;;  %v865_v39 = vmul.f32 1.442695, %v746_v29 }
 0x34c   : > { %v859_v38 = vmul.f32 1.442695, %v743_v14  ;;  %v861_v26 = vmul.f32 1.442695, %v744_v36 }
 0x34d   : > { %1548 = vpow2.f32 %v863_v31 }
 0x34e   : > { %1550 = vpow2.f32 %v865_v39 }
 0x34f   : > { %1552 = vpow2.f32 %v859_v38 }
 0x350   : > { %1554 = vpow2.f32 %v861_v26  ;;  %v918_v52 = vpop.xlane.xlu2 %917 }
 0x351   : > { %1556 = vrcp.f32 %v918_v52  ;;  %v915_v59 = vpop.xlane.xlu0 %914 }
 0x352   : > { %1558 = vrcp.f32 %v915_v59 }
 0x353   : > { %v2213_v10 = vpop.eup %1548 }
 0x354   : > { %v2215_v15 = vpop.eup %1550 }
 0x355   : > { %v2217_v44 = vpop.eup %1552  ;;  %v964_v54 = vadd.f32 %v2215_v15, %v2213_v10 }
 0x356   : > { %v2221_v24 = vpop.eup %1554 }
 0x357   : > { %v1557_v58 = vpop.eup %1556  ;;  %965 = vadd.xlane.f32.xlu2 %v964_v54  ;;  %v961_v29 = vadd.f32 %v2221_v24, %v2217_v44 }
 0x358   : > { %v684_v30 = vpop.xlane.xlu2 %683  ;;  %v2226_v14 = vmul.f32 %v1557_v58, %v1997_v9  ;;  %v2229_v36 = vmul.f32 %v1557_v58, %v1999_v56  ;;  %v1559_v31 = vpop.eup %1558 }
 0x359   : > { %962 = vadd.xlane.f32.xlu0 %v961_v29  ;;  %v749_v39 = vsub.f32 %v2027_v1, %v684_v30  ;;  %v750_v38 = vsub.f32 %v2029_v28, %v684_v30  ;;  %v681_v26 = vpop.xlane.xlu0 %680  ;;  %v2234_v52 = vmul.f32 %v1559_v31, %v1985_v6  ;;  %v2237_v59 = vmul.f32 %v1559_v31, %v1991_v51 }
 0x35a   : > { %v747_v54 = vsub.f32 %v1987_v50, %v681_v26  ;;  %v748_v9 = vsub.f32 %v1993_v37, %v681_v26 }
 0x35b   : > { %v871_v57 = vmul.f32 1.442695, %v749_v39  ;;  %v873_v56 = vmul.f32 1.442695, %v750_v38  ;;  %v236_v39 = vld [vmem:[%s2472_s1 + $0x10] sm:$0xff] }
 0x35c   : > { %v867_v28 = vmul.f32 1.442695, %v747_v54  ;;  %v869_v29 = vmul.f32 1.442695, %v748_v9  ;;  %1399 = vmatmul.msk.f32.gmra.mxu0 %vm262_vm0, %v236_v39  ;;  %1403 = vmatmul.msk.f32.gmra.mxu1 %vm262_vm0, %v236_v39  ;;  %v693_v9 = vsub.f32 %v1765_v42, %v2021_v41  ;;  %v237_v39 = vld [vmem:[%s2472_s1 + $0x18] sm:$0xff]  ;;  %v2535_v42 = vld [vmem:[#allocation4_spill] sm:$0xff] }
 0x35d   : > { %1560 = vpow2.f32 %v871_v57 }
 0x35e   : > { %1562 = vpow2.f32 %v873_v56  ;;  %v759_v33 = vmul.f32 1.442695, %v693_v9 }
 0x35f   : > { %1564 = vpow2.f32 %v867_v28 }
 0x360   : > { %1566 = vpow2.f32 %v869_v29  ;;  %v2245_v6 = vpop.xlane.xlu2 %923  ;;  %v2533_v29 = vld [vmem:[#allocation6_spill] sm:$0xff] }
 0x363   : > { %v2247_v51 = vpop.eup %1560 }
 0x364   : > { %v2249_v50 = vpop.eup %1562  ;;  %1400 = vmatmul.msk.f32.gmra.mxu0 %vm262_vm0, %v237_v39  ;;  %1404 = vmatmul.msk.f32.gmra.mxu1 %vm262_vm0, %v237_v39  ;;  %v2539_v39 = vld [vmem:[#allocation8_spill] sm:$0xff] }
 0x365   : > { %v2251_v37 = vpop.eup %1564  ;;  %v970_v30 = vadd.f32 %v2249_v50, %v2247_v51 }
 0x366   : > { %v2255_v31 = vpop.eup %1566 }
 0x367   : > { %971 = vadd.xlane.f32.xlu2 %v970_v30  ;;  %v967_v57 = vadd.f32 %v2255_v31, %v2251_v37  ;;  %v694_v30 = vsub.f32 %v2533_v29, %v2021_v41 }
 0x368   : > { %v687_v38 = vpop.xlane.xlu2 %686 }
 0x369   : > { %968 = vadd.xlane.f32.xlu0 %v967_v57  ;;  %v751_v26 = vsub.f32 %v2057_v62, %v687_v38  ;;  %v752_v54 = vsub.f32 %v2061_v35, %v687_v38  ;;  %v761_v57 = vmul.f32 1.442695, %v694_v30  ;;  %v2534_v62 = vld [vmem:[#allocation13_spill] sm:$0xff] }
 0x36a   : > { %v691_v35 = vsub.f32 %v2535_v42, %v2534_v62 }
 0x36b   : > { %v875_v56 = vmul.f32 1.442695, %v751_v26  ;;  %v877_v28 = vmul.f32 1.442695, %v752_v54  ;;  %v2536_v26 = vld [vmem:[#allocation5_spill] sm:$0xff] }
 0x36c   : > { %v692_v54 = vsub.f32 %v2536_v26, %v2534_v62 }
 0x36d   : > { %1568 = vpow2.f32 %v875_v56  ;;  %v2537_v56 = vld [vmem:[#allocation16_spill] sm:$0xff] }
 0x36e   : > { %1570 = vpow2.f32 %v877_v28  ;;  %v2538_v28 = vld [vmem:[#allocation7_spill] sm:$0xff]  ;;  %v728_v42 = vsub.f32 %v2539_v39, %v2537_v56 }
 0x36f   : > { %v727_v29 = vsub.f32 %v2538_v28, %v2537_v56  ;;  %1572 = vpow2.f32 %v759_v33 }
 0x370   : > { %v690_v1 = vpop.xlane.xlu2 %689  ;;  %1574 = vpow2.f32 %v761_v57  ;;  %v829_v26 = vmul.f32 1.442695, %v728_v42 }
 0x371   : > { %v753_v38 = vsub.f32 %v2081_v43, %v690_v1  ;;  %v754_v41 = vsub.f32 %v2083_v55, %v690_v1  ;;  %v755_v43 = vmul.f32 1.442695, %v691_v35  ;;  %v757_v1 = vmul.f32 1.442695, %v692_v54  ;;  %v2540_v35 = vld [vmem:[#allocation9_spill] sm:$0xff] }
 0x372   : > { %v827_v62 = vmul.f32 1.442695, %v727_v29  ;;  %v733_v56 = vsub.f32 %v2540_v35, %v2097_v49 }
 0x373   : > { %v2281_v9 = vpop.eup %1568  ;;  %v879_v30 = vmul.f32 1.442695, %v753_v38  ;;  %v881_v58 = vmul.f32 1.442695, %v754_v41  ;;  %v921_v41 = vpop.xlane.xlu0 %920 }
 0x374   : > { %v2285_v23 = vpop.eup %1570 }
 0x375   : > { %1576 = vpow2.f32 %v879_v30  ;;  %v973_v55 = vadd.f32 %v2285_v23, %v2281_v9  ;;  %v2293_v33 = vpop.eup %1572 }
 0x376   : > { %1578 = vpow2.f32 %v881_v58  ;;  %v2295_v38 = vpop.eup %1574  ;;  %v2541_v58 = vld [vmem:[#allocation10_spill] sm:$0xff] }
 0x377   : > { %974 = vadd.xlane.f32.xlu0 %v973_v55  ;;  %1580 = vpow2.f32 %v755_v43  ;;  %v734_v29 = vsub.f32 %v2541_v58, %v2097_v49  ;;  %v886_v39 = vadd.f32 %v2295_v38, %v2293_v33  ;;  %v839_v43 = vmul.f32 1.442695, %v733_v56 }
 0x378   : > { %v2291_v28 = vpop.xlane.xlu2 %905  ;;  %1582 = vpow2.f32 %v757_v1 }
 0x379   : > { %1584 = vpow2.f32 %v827_v62  ;;  %v841_v1 = vmul.f32 1.442695, %v734_v29 }
 0x37a   : > { %1586 = vpow2.f32 %v829_v26 }
 0x37b   : > { %v2297_v57 = vpop.eup %1576  ;;  %1588 = vpow2.f32 %v839_v43  ;;  %v927_v49 = vpop.xlane.xlu0 %926 }
 0x37c   : > { %v2301_v54 = vpop.eup %1578  ;;  %1590 = vpow2.f32 %v841_v1 }
 0x37d   : > { %v976_v30 = vadd.f32 %v2301_v54, %v2297_v57  ;;  %v2309_v42 = vpop.eup %1580  ;;  %1592 = vrcp.f32 %v927_v49 }
 0x37e   : > { %v2311_v55 = vpop.eup %1582 }
 0x37f   : > { %977 = vadd.xlane.f32.xlu2 %v976_v30  ;;  %887 = vadd.xlane.f32.xlu0 %v886_v39  ;;  %v2315_v26 = vpop.eup %1584  ;;  %v883_v58 = vadd.f32 %v2311_v55, %v2309_v42 }
 0x380   : > { %v2313_v62 = vpop.xlane.xlu2 %893  ;;  %2542 = vst [vmem:[#allocation6_spill] sm:$0xff] %v2315_v26  ;;  %v2317_v35 = vpop.eup %1586 }
 0x381   : > { %2543 = vst [vmem:[#allocation13_spill] sm:$0xff] %v2317_v35  ;;  %v937_v56 = vadd.f32 %v2317_v35, %v2315_v26  ;;  %v2323_v29 = vpop.eup %1588  ;;  %v2545_v35 = vld [vmem:[#allocation19_spill] sm:$0xff] }
 0x382   : > { %v2325_v39 = vpop.eup %1590 }
 0x383   : > { %v1593_v43 = vpop.eup %1592  ;;  %v946_v1 = vadd.f32 %v2325_v39, %v2323_v29 }
 0x384   : > { %v1039_v13 = vmul.f32 %v1593_v43, %v2065_v32 }
 0x387   : > { %884 = vadd.xlane.f32.xlu2 %v883_v58  ;;  %938 = vadd.xlane.f32.xlu0 %v937_v56  ;;  %v1040_v58 = vmul.f32 %v1593_v43, %v2071_v20  ;;  %v241_v20 = vld [vmem:[%s2473_s2 + $0x18] sm:$0xff] }
 0x388   : > { %v930_v30 = vpop.xlane.xlu2 %929 }
 0x389   : > { %1594 = vrcp.f32 %v930_v30 }
 0x38a   : > { %1596 = vrcp.f32 %v2245_v6  ;;  %v2544_v6 = vld [vmem:[#allocation21_spill] sm:$0xff] }
 0x38b   : > { %1598 = vrcp.f32 %v921_v41 }
 0x38c   : > { %1600 = vrcp.f32 %v2291_v28 }
 0x38d   : > { %1602 = vrcp.f32 %v2181_v22  ;;  %v2552_v22 = vld [vmem:[#allocation11_spill] sm:$0xff] }
 0x38f   : > { %v1595_v7 = vpop.eup %1594  ;;  %947 = vadd.xlane.f32.xlu2 %v946_v1 }
 0x390   : > { %v1041_v49 = vmul.f32 %v1595_v7, %v2127_v3  ;;  %v1042_v56 = vmul.f32 %v1595_v7, %v2131_v63  ;;  %v1597_v30 = vpop.eup %1596  ;;  %v2549_v7 = vpack.c.bf16 %v2229_v36, %v2237_v59 }
 0x391   : > { %v1599_v61 = vpop.eup %1598  ;;  %v1037_v26 = vmul.f32 %v1597_v30, %v2545_v35  ;;  %v1038_v32 = vmul.f32 %v1597_v30, %v2547_v25  ;;  %v240_v25 = vld [vmem:[%s2473_s2 + $0x10] sm:$0xff] }
 0x392   : > { %v1091_v21 = vpack.c.bf16 %v1041_v49, %v1039_v13  ;;  %v1092_v17 = vpack.c.bf16 %v1042_v56, %v1040_v58  ;;  %v1035_v41 = vmul.f32 %v1599_v61, %v2544_v6  ;;  %v1036_v1 = vmul.f32 %v1599_v61, %v2546_v48  ;;  %v900_v48 = vpop.xlane.xlu1 %899  ;;  %v897_v61 = vpop.xlane.xlu0 %896  ;;  %v2555_v56 = vld [vmem:[#allocation15_spill] sm:$0xff] }
 0x393   : > { %v2550_v13 = vpack.c.bf16 %v2194_v16, %v2202_v47  ;;  %1604 = vrcp.f32 %v897_v61 }
 0x394   : > { %1109 = vmatpush.bf16.xpose.msrb.mxu0 %v1091_v21  ;;  %1123 = vmatpush.bf16.xpose.msrb.mxu1 %v1092_v17  ;;  %v1089_v3 = vpack.c.bf16 %v1037_v26, %v1035_v41  ;;  %v1090_v63 = vpack.c.bf16 %v1038_v32, %v1036_v1  ;;  %v2548_v17 = vpack.c.bf16 %v2226_v14, %v2234_v52  ;;  %v1601_v21 = vpop.eup %1600  ;;  %1606 = vrcp.f32 %v900_v48  ;;  %v2553_v26 = vld [vmem:[#allocation12_spill] sm:$0xff] }
 0x395   : > { %v2551_v14 = vpack.c.bf16 %v2197_v19, %v2205_v11  ;;  %v1603_v36 = vpop.eup %1602  ;;  %v1025_v52 = vmul.f32 %v1601_v21, %v2099_v46  ;;  %v1026_v59 = vmul.f32 %v1601_v21, %v2101_v40  ;;  %1608 = vrcp.f32 %v2313_v62  ;;  %v2554_v40 = vld [vmem:[#allocation14_spill] sm:$0xff]  ;;  %v2556_v62 = vld [vmem:[#allocation17_spill] sm:$0xff] }
 0x396   : > { %v1023_v28 = vmul.f32 %v1603_v36, %v2552_v22  ;;  %v1024_v35 = vmul.f32 %v1603_v36, %v2553_v26 }
 0x398   : > { %v1083_v43 = vpack.c.bf16 %v1025_v52, %v1023_v28  ;;  %v1084_v49 = vpack.c.bf16 %v1026_v59, %v1024_v35 }
 0x399   : > { %v1605_v58 = vpop.eup %1604 }
 0x39a   : > { %v891_v16 = vpop.xlane.xlu1 %890  ;;  %v1607_v47 = vpop.eup %1606  ;;  %v1019_v19 = vmul.f32 %v1605_v58, %v2085_v27  ;;  %v1020_v46 = vmul.f32 %v1605_v58, %v2089_v5  ;;  %v2557_v27 = vld [vmem:[#allocation18_spill] sm:$0xff] }
 0x39b   : > { %259 = vperm.xlu0 %1454, %v241_v20   ;;  %1610 = vrcp.f32 %v891_v16  ;;  %v1021_v11 = vmul.f32 %v1607_v47, %v2554_v40  ;;  %v1022_v30 = vmul.f32 %v1607_v47, %v2555_v56  ;;  %v1609_v1 = vpop.eup %1608 }
 0x39c   : > { %1110 = vmatpush.bf16.xpose.msrb.mxu0 %v1089_v3  ;;  %1124 = vmatpush.bf16.xpose.msrb.mxu1 %v1090_v63  ;;  %v1017_v20 = vmul.f32 %v1609_v1, %v2115_v0  ;;  %v1018_v3 = vmul.f32 %v1609_v1, %v2119_v53 }
 0x39d   : > { %v1081_v6 = vpack.c.bf16 %v1021_v11, %v1019_v19  ;;  %v1082_v41 = vpack.c.bf16 %v1022_v30, %v1020_v46 }
 0x3a1   : > { %v1611_v32 = vpop.eup %1610 }
 0x3a2   : > { %v1015_v63 = vmul.f32 %v1611_v32, %v2556_v62 }
 0x3a4   : > { %1111 = vmatpush.bf16.xpose.msrb.mxu0 %v2548_v17  ;;  %1125 = vmatpush.bf16.xpose.msrb.mxu1 %v2549_v7  ;;  %v1016_v17 = vmul.f32 %v1611_v32, %v2557_v27  ;;  %v1079_v5 = vpack.c.bf16 %v1017_v20, %v1015_v63 }
 0x3a6   : > { %v1080_v7 = vpack.c.bf16 %v1018_v3, %v1016_v17 }
 0x3a7   : > { %254 = vperm.xlu2 %1455, %v240_v25   ;;  %v2371_v25 = vpop.xlane.xlu0 %950 }
 0x3ac   : > { %1112 = vmatpush.bf16.xpose.msrb.mxu0 %v2550_v13  ;;  %1126 = vmatpush.bf16.xpose.msrb.mxu1 %v2551_v14 }
 0x3af   : > { %v2373_v48 = vpop.xlane.xlu0 %959 }
 0x3b4   : > { %1113 = vmatpush.bf16.xpose.msrb.mxu0 %v1083_v43  ;;  %1127 = vmatpush.bf16.xpose.msrb.mxu1 %v1084_v49 }
 0x3ba   : > { %v957_v61 = vpop.xlane.xlu2 %956 }
 0x3bc   : > { %1114 = vmatpush.bf16.xpose.msrb.mxu0 %v1081_v6  ;;  %1128 = vmatpush.bf16.xpose.msrb.mxu1 %v1082_v41 }
 0x3c4   : > { %1115 = vmatpush.bf16.xpose.msrb.mxu0 %v1079_v5  ;;  %1129 = vmatpush.bf16.xpose.msrb.mxu1 %v1080_v7 }
 0x3ca   : > { %v966_v13 = vpop.xlane.xlu2 %965 }
 0x3cc   : > { %v963_v21 = vpop.xlane.xlu0 %962 }
 0x3d9   : > { %v298_v58 = vpop.f32.mrf.mxu0  ;;  %v327_v16 = vpop.f32.mrf.mxu1 }
 0x3da   : > { %v972_v36 = vpop.xlane.xlu2 %971 }
 0x3dc   : > { %v969_v14 = vpop.xlane.xlu0 %968 }
 0x3e1   : > { %v330_v62 = vpop.f32.mrf.mxu1 }
 0x3ea   : > { %v975_v0 = vpop.xlane.xlu0 %974 }
 0x3f2   : > { %v978_v52 = vpop.xlane.xlu2 %977  ;;  %v888_v53 = vpop.xlane.xlu0 %887 }
 0x3f3   : > { %1612 = vrcp.f32 %v978_v52 }
 0x3f4   : > { %1614 = vrcp.f32 %v888_v53 }
 0x3f5   : > { %1616 = vrcp.f32 %v975_v0 }
 0x3f9   : > { %v1613_v22 = vpop.eup %1612 }
 0x3fa   : > { %v885_v59 = vpop.xlane.xlu2 %884  ;;  %v1615_v28 = vpop.eup %1614  ;;  %v1073_v43 = vmul.f32 %v1613_v22, %v2297_v57  ;;  %v1074_v49 = vmul.f32 %v1613_v22, %v2301_v54 }
 0x3fb   : > { %1618 = vrcp.f32 %v885_v59  ;;  %v1617_v26 = vpop.eup %1616  ;;  %v1013_v46 = vmul.f32 %v1615_v28, %v2293_v33  ;;  %v1014_v11 = vmul.f32 %v1615_v28, %v2295_v38  ;;  %v954_v54 = vpop.xlane.xlu1 %953 }
 0x3fc   : > { %1620 = vrcp.f32 %v972_v36  ;;  %v1071_v56 = vmul.f32 %v1617_v26, %v2281_v9  ;;  %v1072_v30 = vmul.f32 %v1617_v26, %v2285_v23  ;;  %v2385_v1 = vpop.xlane.xlu0 %938 }
 0x3fd   : > { %1622 = vrcp.f32 %v969_v14 }
 0x3fe   : > { %v1107_v32 = vpack.c.bf16 %v1073_v43, %v1071_v56  ;;  %v1108_v20 = vpack.c.bf16 %v1074_v49, %v1072_v30  ;;  %1624 = vrcp.f32 %v966_v13 }
 0x3ff   : > { %1626 = vrcp.f32 %v963_v21 }
 0x400   : > { %1628 = vrcp.f32 %v957_v61 }
 0x401   : > { %v1619_v35 = vpop.eup %1618  ;;  %1630 = vrcp.f32 %v2373_v48 }
 0x402   : > { %v2377_v47 = vpop.xlane.xlu2 %947  ;;  %v1011_v19 = vmul.f32 %v1619_v35, %v2309_v42  ;;  %v1012_v40 = vmul.f32 %v1619_v35, %v2311_v55  ;;  %v1621_v41 = vpop.eup %1620  ;;  %1632 = vrcp.f32 %v954_v54 }
 0x403   : > { %v1623_v3 = vpop.eup %1622  ;;  %v1069_v9 = vmul.f32 %v1621_v41, %v2247_v51  ;;  %v1070_v38 = vmul.f32 %v1621_v41, %v2249_v50  ;;  %v301_v55 = vpop.f32.mrf.mxu0  ;;  %1634 = vrcp.f32 %v2371_v25  ;;  %v2560_v41 = vld [vmem:[#allocation6_spill] sm:$0xff] }
 0x404   : > { %v1077_v6 = vpack.c.bf16 %v1013_v46, %v1011_v19  ;;  %v1078_v57 = vpack.c.bf16 %v1014_v11, %v1012_v40  ;;  %v1067_v33 = vmul.f32 %v1623_v3, %v2251_v37  ;;  %v1068_v23 = vmul.f32 %v1623_v3, %v2255_v31  ;;  %v1625_v17 = vpop.eup %1624  ;;  %v945_v0 = vpop.xlane.xlu1 %944  ;;  %v2559_v11 = vld [vmem:[#allocation24_spill] sm:$0xff] }
 0x405   : > { %v1627_v14 = vpop.eup %1626  ;;  %v1065_v31 = vmul.f32 %v1625_v17, %v2213_v10  ;;  %v1066_v53 = vmul.f32 %v1625_v17, %v2215_v15  ;;  %1636 = vrcp.f32 %v2377_v47 }
 0x406   : > { %1116 = vmatpush.bf16.xpose.msrb.mxu0 %v1077_v6  ;;  %1130 = vmatpush.bf16.xpose.msrb.mxu1 %v1078_v57  ;;  %v1105_v7 = vpack.c.bf16 %v1069_v9, %v1067_v33  ;;  %v1106_v13 = vpack.c.bf16 %v1070_v38, %v1068_v23  ;;  %v1063_v50 = vmul.f32 %v1627_v14, %v2217_v44  ;;  %v1629_v22 = vpop.eup %1628  ;;  %1638 = vrcp.f32 %v945_v0 }
 0x407   : > { %v1064_v52 = vmul.f32 %v1627_v14, %v2221_v24  ;;  %v1631_v28 = vpop.eup %1630  ;;  %v1059_v10 = vmul.f32 %v1629_v22, %v2187_v34  ;;  %v1060_v24 = vmul.f32 %v1629_v22, %v2189_v18  ;;  %1640 = vrcp.f32 %v2385_v1  ;;  %v2561_v1 = vld [vmem:[#allocation13_spill] sm:$0xff]  ;;  %v1656_v22 = vld [vmem:[%s1724_s27 + $0x10] sm:$0xff] }
 0x408   : > { %v1103_v59 = vpack.c.bf16 %v1065_v31, %v1063_v50  ;;  %v1061_v15 = vmul.f32 %v1631_v28, %v2149_v4  ;;  %v1062_v48 = vmul.f32 %v1631_v28, %v2153_v60  ;;  %v1633_v43 = vpop.eup %1632 }
 0x409   : > { %v1104_v61 = vpack.c.bf16 %v1066_v53, %v1064_v52  ;;  %v1635_v49 = vpop.eup %1634  ;;  %v1058_v34 = vmul.f32 %v1633_v43, %v2137_v12  ;;  %v2558_v12 = vld [vmem:[#allocation23_spill] sm:$0xff]  ;;  %v1165_v53 = vstv %s232_s17 }
 0x40a   : > { %v255_v42 = vpop.permute.xlu2 %254  ;;  %v1101_v26 = vpack.c.bf16 %v1061_v15, %v1059_v10  ;;  %v1102_v35 = vpack.c.bf16 %v1062_v48, %v1060_v24  ;;  %v1055_v25 = vmul.f32 %v1635_v49, %v2103_v8  ;;  %v1056_v4 = vmul.f32 %v1635_v49, %v2107_v45  ;;  %v1658_v49 = vld [vmem:[%s1724_s27 + $0x18] sm:$0xff] }
 0x40b   : > { %v299_v63 = vadd.f32 %v298_v58, %v255_v42  ;;  %v328_v27 = vadd.f32 %v327_v16, %v255_v42  ;;  %v1057_v58 = vmul.f32 %v1633_v43, %v2133_v2  ;;  %v1637_v19 = vpop.eup %1636  ;;  %v2564_v42 = vld [vmem:[#allocation29_spill] sm:$0xff] }
 0x40c   : > { %v942_v44 = vpop.xlane.xlu1 %941  ;;  %v1100_v60 = vpack.c.bf16 %v1058_v34, %v1056_v4  ;;  %v1639_v46 = vpop.eup %1638  ;;  %v1053_v47 = vmul.f32 %v1637_v19, %v2323_v29  ;;  %v1054_v2 = vmul.f32 %v1637_v19, %v2325_v39  ;;  %v2562_v29 = vld [vmem:[#allocation25_spill] sm:$0xff] }
 0x40d   : > { %v260_v5 = vpop.permute.xlu0 %259  ;;  %v1099_v16 = vpack.c.bf16 %v1057_v58, %v1055_v25  ;;  %1642 = vrcp.f32 %v942_v44  ;;  %v1051_v40 = vmul.f32 %v1639_v46, %v2558_v12  ;;  %v1052_v56 = vmul.f32 %v1639_v46, %v2559_v11  ;;  %v1641_v6 = vpop.eup %1640  ;;  %v1657_v44 = vld [vmem:[%s1724_s27] sm:$0xff]  ;;  %v1659_v34 = vld [vmem:[%s1724_s27 + $0x8] sm:$0xff] }
 0x40e   : > { %1137 = vmatpush.bf16.xpose.msra.mxu0 %v1107_v32  ;;  %1151 = vmatpush.bf16.xpose.msra.mxu1 %v1108_v20  ;;  %v302_v36 = vadd.f32 %v301_v55, %v260_v5  ;;  %v331_v21 = vadd.f32 %v330_v62, %v260_v5  ;;  %v1047_v54 = vmul.f32 %v1641_v6, %v2560_v41  ;;  %v2563_v20 = vld [vmem:[#allocation26_spill] sm:$0xff]  ;;  %v2567_v5 = vld [vmem:[#allocation28_spill] sm:$0xff] }
 0x40f   : > { %v1097_v30 = vpack.c.bf16 %v1053_v47, %v1051_v40  ;;  %v1098_v45 = vpack.c.bf16 %v1054_v2, %v1052_v56  ;;  %v1048_v32 = vmul.f32 %v1641_v6, %v2561_v1  ;;  %v2565_v62 = vld [vmem:[#allocation30_spill] sm:$0xff] }
 0x410   : > { %v2391_v51 = vpack.c.bf16 %v302_v36, %v299_v63  ;;  %v2393_v37 = vpack.c.bf16 %v331_v21, %v328_v27  ;;  %v2566_v27 = vld [vmem:[#allocation27_spill] sm:$0xff] }
 0x412   : > { %1117 = vmatmul.bf16.vlgmr.msrb.gmra.mxu0 %v2391_v51  ;;  %1131 = vmatmul.bf16.vlgmr.msrb.gmra.mxu1 %v2393_v37 }
 0x413   : > { %v1643_v57 = vpop.eup %1642 }
 0x414   : > { %v933_v18 = vpop.xlane.xlu1 %932  ;;  %v1049_v39 = vmul.f32 %v1643_v57, %v2562_v29  ;;  %v1050_v3 = vmul.f32 %v1643_v57, %v2563_v20 }
 0x416   : > { %1138 = vmatpush.bf16.xpose.msra.mxu0 %v1105_v7  ;;  %1152 = vmatpush.bf16.xpose.msra.mxu1 %v1106_v13  ;;  %v1095_v33 = vpack.c.bf16 %v1049_v39, %v1047_v54  ;;  %v1096_v9 = vpack.c.bf16 %v1050_v3, %v1048_v32 }
 0x41c   : > { %v936_v8 = vpop.xlane.xlu1 %935 }
 0x41d   : > { %1644 = vrcp.f32 %v936_v8 }
 0x41e   : > { %1139 = vmatpush.bf16.xpose.msra.mxu0 %v1103_v59  ;;  %1153 = vmatpush.bf16.xpose.msra.mxu1 %v1104_v61  ;;  %1646 = vrcp.f32 %v933_v18 }
 0x423   : > { %v1645_v23 = vpop.eup %1644 }
 0x424   : > { %v1647_v38 = vpop.eup %1646  ;;  %v1045_v55 = vmul.f32 %v1645_v23, %v2564_v42  ;;  %v1046_v63 = vmul.f32 %v1645_v23, %v2565_v62 }
 0x425   : > { %v1043_v17 = vmul.f32 %v1647_v38, %v2566_v27  ;;  %v1044_v7 = vmul.f32 %v1647_v38, %v2567_v5 }
 0x426   : > { %1140 = vmatpush.bf16.xpose.msra.mxu0 %v1101_v26  ;;  %1154 = vmatpush.bf16.xpose.msra.mxu1 %v1102_v35 }
 0x427   : > { %v1093_v13 = vpack.c.bf16 %v1045_v55, %v1043_v17  ;;  %v1094_v14 = vpack.c.bf16 %v1046_v63, %v1044_v7 }
 0x42e   : > { %1141 = vmatpush.bf16.xpose.msra.mxu0 %v1099_v16  ;;  %1155 = vmatpush.bf16.xpose.msra.mxu1 %v1100_v60 }
 0x436   : > { %1142 = vmatpush.bf16.xpose.msra.mxu0 %v1097_v30  ;;  %1156 = vmatpush.bf16.xpose.msra.mxu1 %v1098_v45 }
 0x43e   : > { %1143 = vmatpush.bf16.xpose.msra.mxu0 %v1095_v33  ;;  %1157 = vmatpush.bf16.xpose.msra.mxu1 %v1096_v9 }
 0x446   : > { %1144 = vmatpush.bf16.xpose.msra.mxu0 %v1093_v13  ;;  %1158 = vmatpush.bf16.xpose.msra.mxu1 %v1094_v14 }
 0x44d   : > { %1145 = vmatmul.bf16.vlgmr.msra.gmra.mxu0 %v2391_v51  ;;  %1159 = vmatmul.bf16.vlgmr.msra.gmra.mxu1 %v2393_v37 }
 0x48f   : > { %v1118_v36 = vpop.f32.mrf.mxu0  ;;  %v1132_v21 = vpop.f32.mrf.mxu1 }
 0x490   : > { %v1133_v31 = vadd.f32 %v1132_v21, %v1118_v36 }
 0x492   : > { %v1166_v61 = vmul.f32 %v1165_v53, %v1133_v31 }
 0x494   : > { %v2432_v51 = vadd.f32 %v1657_v44, %v1166_v61 }
 0x497   : > { %v1120_v0 = vpop.f32.mrf.mxu0  ;;  %v1134_v50 = vpop.f32.mrf.mxu1 }
 0x498   : > { %v1135_v52 = vadd.f32 %v1134_v50, %v1120_v0  ;;  %v1320_v50 = vstv %s233_s18 }
 0x49a   : > { %v1168_v59 = vmul.f32 %v1165_v53, %v1135_v52 }
 0x49c   : > { %v2428_v28 = vadd.f32 %v1656_v22, %v1168_v59 }
 0x49e   : > { %1188 = vmatpush.xpose.msrb.mxu0 %v2428_v28 }
 0x4a2   : > { %1189 = vmatpush.xpose.msrb.mxu0 %v2432_v51 }
 0x4a5   : > { %1190 = vmatmul.f32.vlgmr.msrb.gmra.mxu0 %v2432_v51 }
 0x4a6   : > { %1288 = vmatpush.msra.mxu0 %v2428_v28 }
 0x4a8   : > { %1289 = vmatpush.msra.mxu0 %v2432_v51 }
 0x4ad   : > { %1193 = vmatmul.f32.gmra.mxu0 %v2428_v28 }
 0x4ca   : > { %v1146_v37 = vpop.f32.mrf.mxu0  ;;  %v1160_v10 = vpop.f32.mrf.mxu1 }
 0x4cb   : > { %v1161_v48 = vadd.f32 %v1160_v10, %v1146_v37 }
 0x4cd   : > { %v1167_v43 = vmul.f32 %v1165_v53, %v1161_v48 }
 0x4cf   : > { %v2444_v18 = vadd.f32 %v1659_v34, %v1167_v43 }
 0x4d2   : > { %v1148_v24 = vpop.f32.mrf.mxu0  ;;  %v1162_v15 = vpop.f32.mrf.mxu1 }
 0x4d3   : > { %v1163_v26 = vadd.f32 %v1162_v15, %v1148_v24 }
 0x4d5   : > { %v1169_v35 = vmul.f32 %v1165_v53, %v1163_v26 }
 0x4d7   : > { %v2440_v58 = vadd.f32 %v1658_v49, %v1169_v35 }
 0x4d9   : > { %1211 = vmatpush.xpose.msrb.mxu1 %v2440_v58 }
 0x4dd   : > { %1212 = vmatpush.xpose.msrb.mxu1 %v2444_v18 }
 0x4e0   : > { %1213 = vmatmul.f32.vlgmr.msrb.gmra.mxu1 %v2444_v18 }
 0x4e1   : > { %1311 = vmatpush.msra.mxu1 %v2440_v58 }
 0x4e3   : > { %1312 = vmatpush.msra.mxu1 %v2444_v18 }
 0x4e8   : > { %1216 = vmatmul.f32.gmra.mxu1 %v2440_v58 }
 0x522   : > { %v1191_v25 = vpop.f32.mrf.mxu0 }
 0x52a   : > { %v1194_v19 = vpop.f32.mrf.mxu0 }
 0x55d   : > { %v1214_v4 = vpop.f32.mrf.mxu1 }
 0x55e   : > { %v1215_v16 = vadd.f32 %v1214_v4, %v1191_v25 }
 0x560   : > { %v1220_v60 = vsel %vm262_vm0, %v1215_v16, inf }
 0x561   : > { %1221 = vmin.xlane.f32.xlu0 %v1220_v60 }
 0x565   : > { %v1217_v46 = vpop.f32.mrf.mxu1 }
 0x566   : > { %v1218_v47 = vadd.f32 %v1217_v46, %v1194_v19 }
 0x568   : > { %v1223_v2 = vsel %vm262_vm0, %v1218_v47, inf }
 0x569   : > { %1224 = vmin.xlane.f32.xlu1 %v1223_v2 }
 0x5d4   : > { %v1222_v12 = vpop.xlane.xlu0 %1221 }
 0x5d5   : > { %v1226_v40 = vsub.f32 %v1222_v12, %v1215_v16 }
 0x5d7   : > { %v1228_v11 = vmul.f32 1.442695, %v1226_v40 }
 0x5d9   : > { %1648 = vpow2.f32 %v1228_v11 }
 0x5dc   : > { %v1225_v56 = vpop.xlane.xlu1 %1224 }
 0x5dd   : > { %v1227_v8 = vsub.f32 %v1225_v56, %v1218_v47 }
 0x5df   : > { %v1649_v30 = vpop.eup %1648  ;;  %v1230_v45 = vmul.f32 1.442695, %v1227_v8 }
 0x5e0   : > { %v1232_v6 = vsel %vm262_vm0, %v1649_v30, 0.0 }
 0x5e1   : > { %1650 = vpow2.f32 %v1230_v45  ;;  %1233 = vadd.xlane.f32.xlu2 %v1232_v6 }
 0x5e7   : > { %v1651_v57 = vpop.eup %1650 }
 0x5e8   : > { %v1235_v41 = vsel %vm262_vm0, %v1651_v57, 0.0 }
 0x5e9   : > { %1236 = vadd.xlane.f32.xlu1 %v1235_v41 }
 0x654   : > { %v1234_v54 = vpop.xlane.xlu2 %1233 }
 0x655   : > { %1652 = vrcp.f32 %v1234_v54  ;;  %v1249_v20 = vand.u32 2147483648, %v1234_v54  ;;  %v1247_v33 = vand.u32 2147483647, %v1234_v54  ;;  %vm1243_vm4 = vweird.f32 %v1234_v54 }
 0x657   : > { %v1250_v38 = vor.u32 1.1754944e-38, %v1249_v20  ;;  %vm1248_vm6 = vcmp.eq.f32.partialorder %v1247_v33, 8.507059e+37 }
 0x65b   : > { %v1653_v1 = vpop.eup %1652 }
 0x65c   : > { %v1239_v32 = vmul.f32 %v1653_v1, %v1234_v54  ;;  %v1237_v29 = vpop.xlane.xlu1 %1236  ;;  %vm1244_vm3 = vweird.f32 %v1653_v1 }
 0x65d   : > { %1654 = vrcp.f32 %v1237_v29  ;;  %vm1245_vm5 = vmor %vm1243_vm4, %vm1244_vm3  ;;  %v1264_v17 = vand.u32 2147483648, %v1237_v29  ;;  %v1262_v7 = vand.u32 2147483647, %v1237_v29  ;;  %vm1258_vm8 = vweird.f32 %v1237_v29 }
 0x65e   : > { %v1240_v39 = vsub.f32 1.0, %v1239_v32 }
 0x65f   : > { %v1265_v14 = vor.u32 1.1754944e-38, %v1264_v17  ;;  %vm1263_vm10 = vcmp.eq.f32.partialorder %v1262_v7, 8.507059e+37 }
 0x660   : > { %v1241_v3 = vmul.f32 %v1653_v1, %v1240_v39 }
 0x662   : > { %v1242_v9 = vadd.f32 %v1653_v1, %v1241_v3 }
 0x663   : > { %v1655_v23 = vpop.eup %1654 }
 0x664   : > { %v1246_v42 = vsel %vm1245_vm5, %v1653_v1, %v1242_v9  ;;  %v1254_v55 = vmul.f32 %v1655_v23, %v1237_v29  ;;  %vm1259_vm7 = vweird.f32 %v1655_v23 }
 0x665   : > { %v1251_v62 = vsel %vm1248_vm6, %v1250_v38, %v1246_v42  ;;  %vm1260_vm9 = vmor %vm1258_vm8, %vm1259_vm7 }
 0x666   : > { %v1252_v63 = vmul.f32 %v1649_v30, %v1251_v62  ;;  %v1255_v27 = vsub.f32 1.0, %v1254_v55 }
 0x668   : > { %v1256_v5 = vmul.f32 %v1655_v23, %v1255_v27  ;;  %1437 = vmatmul.msk.f32.vlgmr.msra.gmra.mxu0 %vm262_vm0, %v1252_v63  ;;  %1439 = vmatmul.msk.f32.vlgmr.msra.gmra.mxu1 %vm262_vm0, %v1252_v63 }
 0x66a   : > { %v1257_v13 = vadd.f32 %v1655_v23, %v1256_v5 }
 0x66c   : > { %v1261_v36 = vsel %vm1260_vm9, %v1655_v23, %v1257_v13 }
 0x66d   : > { %v1266_v21 = vsel %vm1263_vm10, %v1265_v14, %v1261_v36 }
 0x66e   : > { %v1267_v0 = vmul.f32 %v1651_v57, %v1266_v21 }
 0x670   : > { %1438 = vmatmul.msk.f32.gmra.mxu0 %vm262_vm0, %v1267_v0  ;;  %1440 = vmatmul.msk.f32.gmra.mxu1 %vm262_vm0, %v1267_v0 }
 0x6e5   : > { %v1291_v31 = vpop.f32.mrf.mxu0  ;;  %v1314_v52 = vpop.f32.mrf.mxu1 }
 0x6e6   : > { %v1321_v53 = vmul.f32 %v1320_v50, %v1291_v31  ;;  %v1322_v59 = vmul.f32 %v1320_v50, %v1314_v52 }
 0x6e8   : > { %v1325_v61 = vadd.f32 %v1321_v53, %v2432_v51  ;;  %v1326_v22 = vadd.f32 %v1322_v59, %v2444_v18 }
 0x6ea   : > { %1329 = vst [vmem:[%s226_s21] sm:$0xff] %v1325_v61 }
 0x6eb   : > { %1330 = vst [vmem:[%s226_s21 + $0x8] sm:$0xff] %v1326_v22 }
 0x6ed   : > { %v1294_v44 = vpop.f32.mrf.mxu0  ;;  %v1317_v37 = vpop.f32.mrf.mxu1 }
 0x6ee   : > { %v1323_v10 = vmul.f32 %v1320_v50, %v1294_v44  ;;  %v1324_v24 = vmul.f32 %v1320_v50, %v1317_v37 }
 0x6f0   : > { %v1327_v15 = vadd.f32 %v1323_v10, %v2428_v28  ;;  %v1328_v48 = vadd.f32 %v1324_v24, %v2440_v58 }
 0x6f2   : > { %1331 = vst [vmem:[%s226_s21 + $0x10] sm:$0xff] %v1327_v15 }
 0x6f3   : > { %1332 = vst [vmem:[%s226_s21 + $0x18] sm:$0xff] %v1328_v48 }
 0x6f4 PF: > { %s17_s22 = sadd.s32 1, %s1666_s22  }
 0x6f5   : > { %p14_p4 = scmp.ge.s32.totalorder %s17_s22, 4  }
 0x6f7   :  { %16 = sbr.rel (!%p14_p4) target bundleno = 3 (0x3), region = 70 }

// kernel: tofr_forward.3
= control target key start
LH: loop header
LB: loop body
LE: loop exit
PB: predicated region body
PF: predicated region fallthrough
CT: control target
= control target key end

     0   :  { %vm356_vm0 = vcmask 523264   ;;  %s2245_s1 = inlined_call_operand.vmem [shape: bf16[192,512], index: 1, kind: input, shape index: {}]   ;;  %s2246_s0 = inlined_call_operand.vmem [shape: bf16[64,192], index: 0, kind: input, shape index: {}]   ;;  %s2247_s3 = inlined_call_operand.vmem [shape: f32[32,1], index: 3, kind: input, shape index: {}]   ;;  %s2248_s2 = inlined_call_operand.vmem [shape: f32[1,512], index: 2, kind: input, shape index: {}]   ;;  %s2249_s5 = inlined_call_operand.vmem [shape: f32[32,1], index: 5, kind: input, shape index: {}]   ;;  %s2250_s4 = inlined_call_operand.vmem [shape: f32[32,1], index: 4, kind: input, shape index: {}]   ;;  %s2251_s6 = inlined_call_operand.vmem [shape: f32[32,256], index: 6, kind: output, shape index: {}]  }
   0x1   :  { %v1217_v0 = vld [vmem:[%s2245_s1 + $0xe0] sm:$0xf]  ;;  %v1349_v1 = vld [vmem:[%s2245_s1 + $0xec] sm:$0xf0]  ;;  %v1347_v2 = vld [vmem:[%s2245_s1 + $0xe4] sm:$0xf] }
   0x2   :  { %v1218_v3 = vor.u32 %v1349_v1, %v1217_v0  ;;  %v1219_v4 = vld [vmem:[%s2245_s1 + $0xf0] sm:$0xf0]  ;;  %v1363_v5 = vld [vmem:[%s2245_s1 + $0x164] sm:$0xf]  ;;  %v1201_v9 = vld [vmem:[%s2245_s1 + $0xc0] sm:$0xf] }
   0x3   :  { %v1283_v6 = vld [vmem:[%s2245_s1 + $0x170] sm:$0xf0]  ;;  %v1222_v7 = vor.u32 %v1347_v2, %v1219_v4  ;;  %v1345_v10 = vld [vmem:[%s2245_s1 + $0xcc] sm:$0xf0]  ;;  %v1343_v11 = vld [vmem:[%s2245_s1 + $0xc4] sm:$0xf] }
   0x4   :  { %v1286_v8 = vor.u32 %v1363_v5, %v1283_v6  ;;  %369 = vmatpush.bf16.msra.mxu0 %v1218_v3  ;;  %v1202_v12 = vor.u32 %v1345_v10, %v1201_v9  ;;  %v1203_v13 = vld [vmem:[%s2245_s1 + $0xd0] sm:$0xf0]  ;;  %v1359_v14 = vld [vmem:[%s2245_s1 + $0x144] sm:$0xf]  ;;  %v1281_v18 = vld [vmem:[%s2245_s1 + $0x160] sm:$0xf] }
   0x5   :  { %v1267_v15 = vld [vmem:[%s2245_s1 + $0x150] sm:$0xf0]  ;;  %427 = vmatpush.bf16.msra.mxu2 %v1222_v7  ;;  %v1206_v16 = vor.u32 %v1343_v11, %v1203_v13  ;;  %v1365_v19 = vld [vmem:[%s2245_s1 + $0x16c] sm:$0xf0]  ;;  %v1185_v20 = vld [vmem:[%s2245_s1 + $0xa0] sm:$0xf] }
   0x6   :  { %460 = vmatpush.bf16.msra.mxu3 %v1286_v8  ;;  %v1270_v17 = vor.u32 %v1359_v14, %v1267_v15  ;;  %v1282_v21 = vor.u32 %v1365_v19, %v1281_v18  ;;  %v1341_v22 = vld [vmem:[%s2245_s1 + $0xac] sm:$0xf0]  ;;  %v1339_v23 = vld [vmem:[%s2245_s1 + $0xa4] sm:$0xf]  ;;  %v1187_v24 = vld [vmem:[%s2245_s1 + $0xb0] sm:$0xf0] }
   0x7   :  { %v1355_v25 = vld [vmem:[%s2245_s1 + $0x124] sm:$0xf]  ;;  %v1251_v26 = vld [vmem:[%s2245_s1 + $0x130] sm:$0xf0]  ;;  %v1265_v27 = vld [vmem:[%s2245_s1 + $0x140] sm:$0xf]  ;;  %v1186_v28 = vor.u32 %v1341_v22, %v1185_v20  ;;  %v1190_v32 = vor.u32 %v1339_v23, %v1187_v24 }
   0x8   :  { %370 = vmatpush.bf16.msra.mxu0 %v1202_v12  ;;  %402 = vmatpush.bf16.msra.mxu1 %v1282_v21  ;;  %v1361_v29 = vld [vmem:[%s2245_s1 + $0x14c] sm:$0xf0]  ;;  %v1169_v30 = vld [vmem:[%s2245_s1 + $0x80] sm:$0xf]  ;;  %v1254_v33 = vor.u32 %v1355_v25, %v1251_v26  ;;  %v1335_v35 = vld [vmem:[%s2245_s1 + $0x84] sm:$0xf] }
   0x9   :  { %v1337_v31 = vld [vmem:[%s2245_s1 + $0x8c] sm:$0xf0]  ;;  %428 = vmatpush.bf16.msra.mxu2 %v1206_v16  ;;  %v1266_v34 = vor.u32 %v1361_v29, %v1265_v27  ;;  %v1171_v36 = vld [vmem:[%s2245_s1 + $0x90] sm:$0xf0]  ;;  %v1351_v37 = vld [vmem:[%s2245_s1 + $0x104] sm:$0xf] }
   0xa   :  { %461 = vmatpush.bf16.msra.mxu3 %v1270_v17  ;;  %v1235_v38 = vld [vmem:[%s2245_s1 + $0x110] sm:$0xf0]  ;;  %v1249_v39 = vld [vmem:[%s2245_s1 + $0x120] sm:$0xf]  ;;  %v1357_v40 = vld [vmem:[%s2245_s1 + $0x12c] sm:$0xf0]  ;;  %v1170_v41 = vor.u32 %v1337_v31, %v1169_v30  ;;  %v1174_v45 = vor.u32 %v1335_v35, %v1171_v36 }
   0xb   :  { %v1250_v42 = vor.u32 %v1357_v40, %v1249_v39  ;;  %v1311_v43 = vld [vmem:[%s2246_s0 + $0x4] sm:$0xf]  ;;  %v1075_v44 = vld [vmem:[%s2246_s0 + $0x8] sm:$0xf0]  ;;  %v1238_v46 = vor.u32 %v1351_v37, %v1235_v38  ;;  %v1153_v47 = vld [vmem:[%s2245_s1 + $0x60] sm:$0xf] }
   0xc   :  { %371 = vmatpush.bf16.msra.mxu0 %v1186_v28  ;;  %403 = vmatpush.bf16.msra.mxu1 %v1266_v34  ;;  %v1333_v48 = vld [vmem:[%s2245_s1 + $0x6c] sm:$0xf0]  ;;  %v1331_v49 = vld [vmem:[%s2245_s1 + $0x64] sm:$0xf]  ;;  %v1155_v50 = vld [vmem:[%s2245_s1 + $0x70] sm:$0xf0]  ;;  %v1529_v53 = vor.u32 %v1311_v43, %v1075_v44 }
   0xd   :  { %429 = vmatpush.bf16.msra.mxu2 %v1190_v32  ;;  %v1233_v51 = vld [vmem:[%s2245_s1 + $0x100] sm:$0xf]  ;;  %v1353_v52 = vld [vmem:[%s2245_s1 + $0x10c] sm:$0xf0]  ;;  %v1154_v54 = vor.u32 %v1333_v48, %v1153_v47  ;;  %v1158_v55 = vor.u32 %v1331_v49, %v1155_v50  ;;  %v1289_v59 = vld [vmem:[%s2245_s1 + $0x168] sm:$0xf] }
   0xe   :  { %462 = vmatpush.bf16.msra.mxu3 %v1254_v33  ;;  %v1234_v56 = vor.u32 %v1353_v52, %v1233_v51  ;;  %v1137_v57 = vld [vmem:[%s2245_s1 + $0x40] sm:$0xf]  ;;  %v1329_v58 = vld [vmem:[%s2245_s1 + $0x4c] sm:$0xf0]  ;;  %v1327_v60 = vld [vmem:[%s2245_s1 + $0x44] sm:$0xf] }
   0xf   :  { %v1139_v61 = vld [vmem:[%s2245_s1 + $0x50] sm:$0xf0]  ;;  %v1366_v62 = vld [vmem:[%s2245_s1 + $0x174] sm:$0xf0]  ;;  %v1121_v63 = vld [vmem:[%s2245_s1 + $0x20] sm:$0xf]  ;;  %v1138_v1 = vor.u32 %v1329_v58, %v1137_v57 }
  0x10   :  { %372 = vmatpush.bf16.msra.mxu0 %v1170_v41  ;;  %404 = vmatpush.bf16.msra.mxu1 %v1250_v42  ;;  %v1290_v0 = vor.u32 %v1366_v62, %v1289_v59  ;;  %v1325_v2 = vld [vmem:[%s2245_s1 + $0x2c] sm:$0xf0]  ;;  %v1225_v3 = vld [vmem:[%s2245_s1 + $0xe8] sm:$0xf]  ;;  %v1350_v4 = vld [vmem:[%s2245_s1 + $0xf4] sm:$0xf0]  ;;  %v1142_v5 = vor.u32 %v1327_v60, %v1139_v61 }
  0x11   :  { %430 = vmatpush.bf16.msra.mxu2 %v1174_v45  ;;  %v1323_v6 = vld [vmem:[%s2245_s1 + $0x24] sm:$0xf]  ;;  %v1123_v7 = vld [vmem:[%s2245_s1 + $0x30] sm:$0xf0]  ;;  %v1226_v8 = vor.u32 %v1350_v4, %v1225_v3  ;;  %v1379_v10 = vmov 0   ;;  %v1122_v16 = vor.u32 %v1325_v2, %v1121_v63  ;;  %v602_v32 = vld [vmem:[%s2247_s3 + $0x8] sm:$0xff] }
  0x12   :  { %463 = vmatpush.bf16.msra.mxu3 %v1238_v46  ;;  %v601_v9 = vld [vmem:[%s2247_s3] sm:$0xff]  ;;  %1368 = vset.pattern.permute.xlu0 %v1379_v10  ;;  %v1209_v11 = vld [vmem:[%s2245_s1 + $0xc8] sm:$0xf]  ;;  %v1346_v12 = vld [vmem:[%s2245_s1 + $0xd4] sm:$0xf0]  ;;  %v1126_v21 = vor.u32 %v1323_v6, %v1123_v7 }
  0x13   :  { %v1273_v13 = vld [vmem:[%s2245_s1 + $0x148] sm:$0xf]  ;;  %v1210_v14 = vor.u32 %v1346_v12, %v1209_v11  ;;  %607 = vperm.xlu0 %1368, %v601_v9   ;;  %v1362_v15 = vld [vmem:[%s2245_s1 + $0x154] sm:$0xf0]  ;;  %v1105_v17 = vld [vmem:[%s2245_s1] sm:$0xf]  ;;  %1369 = vset.pattern.permute.xlu1 %v1379_v10 }
  0x14   :  { %373 = vmatpush.bf16.msra.mxu0 %v1154_v54  ;;  %405 = vmatpush.bf16.msra.mxu1 %v1234_v56  ;;  %v1321_v18 = vld [vmem:[%s2245_s1 + $0xc] sm:$0xf0]  ;;  %v1319_v19 = vld [vmem:[%s2245_s1 + $0x4] sm:$0xf]  ;;  %v1274_v20 = vor.u32 %v1362_v15, %v1273_v13  ;;  %v1107_v22 = vld [vmem:[%s2245_s1 + $0x10] sm:$0xf0] }
  0x15   :  { %1299 = vmatmul.msk.bf16.vlgmr.msra.gmra.mxu3 %vm356_vm0, %v1529_v53  ;;  %431 = vmatpush.bf16.msra.mxu2 %v1158_v55  ;;  %v1364_v23 = vld [vmem:[%s2245_s1 + $0x16c] sm:$0xf]  ;;  %v1073_v25 = vld [vmem:[%s2246_s0] sm:$0xf]  ;;  %v1312_v26 = vld [vmem:[%s2246_s0 + $0x4] sm:$0xf0]  ;;  %v1106_v34 = vor.u32 %v1321_v18, %v1105_v17  ;;  %v1110_v38 = vor.u32 %v1319_v19, %v1107_v22 }
  0x16   :  { %518 = vmatpush.bf16.msrb.mxu3 %v1290_v0  ;;  %v1348_v24 = vld [vmem:[%s2245_s1 + $0xec] sm:$0xf]  ;;  %v1227_v27 = vld [vmem:[%s2245_s1 + $0xf8] sm:$0xf0]  ;;  %v1193_v28 = vld [vmem:[%s2245_s1 + $0xa8] sm:$0xf]  ;;  %1370 = vset.pattern.permute.xlu2 %v1379_v10  ;;  %v1652_v47 = vor.u32 %v1312_v26, %v1073_v25 }
  0x17   :  { %1295 = vmatmul.msk.bf16.vlgmr.msra.gmra.mxu1 %vm356_vm0, %v1529_v53  ;;  %v1342_v29 = vld [vmem:[%s2245_s1 + $0xb4] sm:$0xf0]  ;;  %v1291_v30 = vld [vmem:[%s2245_s1 + $0x178] sm:$0xf0]  ;;  %v1177_v33 = vld [vmem:[%s2245_s1 + $0x88] sm:$0xf]  ;;  %v1230_v41 = vor.u32 %v1348_v24, %v1227_v27 }
  0x18   :  { %485 = vmatpush.bf16.msrb.mxu1 %v1226_v8  ;;  %374 = vmatpush.bf16.msra.mxu0 %v1138_v1  ;;  %v1194_v31 = vor.u32 %v1342_v29, %v1193_v28  ;;  %v1338_v35 = vld [vmem:[%s2245_s1 + $0x94] sm:$0xf0]  ;;  %v603_v36 = vld [vmem:[%s2247_s3 + $0x10] sm:$0xff]  ;;  %v1257_v37 = vld [vmem:[%s2245_s1 + $0x128] sm:$0xf]  ;;  %v1294_v43 = vor.u32 %v1364_v23, %v1291_v30 }
  0x19   :  { %432 = vmatpush.bf16.msra.mxu2 %v1142_v5  ;;  %v1313_v39 = vld [vmem:[%s2246_s0 + $0x14] sm:$0xf]  ;;  %v1083_v40 = vld [vmem:[%s2246_s0 + $0x18] sm:$0xf0]  ;;  %617 = vperm.xlu1 %1369, %v603_v36   ;;  %v1358_v42 = vld [vmem:[%s2245_s1 + $0x134] sm:$0xf0]  ;;  %v1178_v50 = vor.u32 %v1338_v35, %v1177_v33 }
  0x1a   :  { %519 = vmatpush.bf16.msrb.mxu3 %v1274_v20  ;;  %v1344_v44 = vld [vmem:[%s2245_s1 + $0xcc] sm:$0xf]  ;;  %v1211_v45 = vld [vmem:[%s2245_s1 + $0xd8] sm:$0xf0]  ;;  %v1258_v46 = vor.u32 %v1358_v42, %v1257_v37  ;;  %v1660_v51 = vor.u32 %v1313_v39, %v1083_v40  ;;  %v1161_v59 = vld [vmem:[%s2245_s1 + $0x68] sm:$0xf] }
  0x1b   :  { %v1360_v48 = vld [vmem:[%s2245_s1 + $0x14c] sm:$0xf]  ;;  %v1275_v49 = vld [vmem:[%s2245_s1 + $0x158] sm:$0xf0]  ;;  %612 = vperm.xlu0 %1368, %v602_v32   ;;  %v1214_v52 = vor.u32 %v1344_v44, %v1211_v45  ;;  %v1334_v61 = vld [vmem:[%s2245_s1 + $0x74] sm:$0xf0] }
  0x1c   :  { %486 = vmatpush.bf16.msrb.mxu1 %v1210_v14  ;;  %375 = vmatpush.bf16.msra.mxu0 %v1122_v16  ;;  %v1278_v54 = vor.u32 %v1360_v48, %v1275_v49  ;;  %v1340_v55 = vld [vmem:[%s2245_s1 + $0xac] sm:$0xf]  ;;  %v1195_v56 = vld [vmem:[%s2245_s1 + $0xb8] sm:$0xf0]  ;;  %v1162_v2 = vor.u32 %v1334_v61, %v1161_v59  ;;  %v1145_v3 = vld [vmem:[%s2245_s1 + $0x48] sm:$0xf] }
  0x1d   :  { %433 = vmatpush.bf16.msra.mxu2 %v1126_v21  ;;  %v1356_v57 = vld [vmem:[%s2245_s1 + $0x12c] sm:$0xf]  ;;  %v1259_v58 = vld [vmem:[%s2245_s1 + $0x138] sm:$0xf0]  ;;  %v1198_v60 = vor.u32 %v1340_v55, %v1195_v56  ;;  %v1330_v5 = vld [vmem:[%s2245_s1 + $0x54] sm:$0xf0] }
  0x1e   :  { %520 = vmatpush.bf16.msrb.mxu3 %v1258_v46  ;;  %v604_v62 = vld [vmem:[%s2247_s3 + $0x18] sm:$0xff]  ;;  %v1336_v63 = vld [vmem:[%s2245_s1 + $0x8c] sm:$0xf]  ;;  %v1262_v1 = vor.u32 %v1356_v57, %v1259_v58  ;;  %v1241_v6 = vld [vmem:[%s2245_s1 + $0x108] sm:$0xf]  ;;  %v1146_v10 = vor.u32 %v1330_v5, %v1145_v3 }
  0x1f   :  { %v1179_v0 = vld [vmem:[%s2245_s1 + $0x98] sm:$0xf0]  ;;  %v1354_v7 = vld [vmem:[%s2245_s1 + $0x114] sm:$0xf0]  ;;  %v1332_v8 = vld [vmem:[%s2245_s1 + $0x6c] sm:$0xf] }
  0x20   :  { %487 = vmatpush.bf16.msrb.mxu1 %v1194_v31  ;;  %376 = vmatpush.bf16.msra.mxu0 %v1106_v34  ;;  %v1182_v4 = vor.u32 %v1336_v63, %v1179_v0  ;;  %v1163_v9 = vld [vmem:[%s2245_s1 + $0x78] sm:$0xf0]  ;;  %v1242_v11 = vor.u32 %v1354_v7, %v1241_v6  ;;  %v1129_v12 = vld [vmem:[%s2245_s1 + $0x28] sm:$0xf]  ;;  %v1326_v13 = vld [vmem:[%s2245_s1 + $0x34] sm:$0xf0] }
  0x21   :  { %434 = vmatpush.bf16.msra.mxu2 %v1110_v38  ;;  %622 = vperm.xlu1 %1369, %v604_v62   ;;  %v1081_v14 = vld [vmem:[%s2246_s0 + $0x10] sm:$0xf]  ;;  %v1314_v15 = vld [vmem:[%s2246_s0 + $0x14] sm:$0xf0]  ;;  %v1315_v16 = vld [vmem:[%s2246_s0 + $0x24] sm:$0xf]  ;;  %v1166_v18 = vor.u32 %v1332_v8, %v1163_v9  ;;  %v1130_v19 = vor.u32 %v1326_v13, %v1129_v12 }
  0x22   :  { %521 = vmatpush.bf16.msrb.mxu3 %v1242_v11  ;;  %v1091_v17 = vld [vmem:[%s2246_s0 + $0x28] sm:$0xf0]  ;;  %v1147_v21 = vld [vmem:[%s2245_s1 + $0x58] sm:$0xf0]  ;;  %v1082_v22 = vor.u32 %v1314_v15, %v1081_v14  ;;  %v1113_v27 = vld [vmem:[%s2245_s1 + $0x8] sm:$0xf] }
  0x23   :  { %377 = vmatmul.bf16.vlgmr.msra.gmra.mxu0 %v1652_v47  ;;  %v1328_v20 = vld [vmem:[%s2245_s1 + $0x4c] sm:$0xf]  ;;  %v1094_v23 = vor.u32 %v1315_v16, %v1091_v17  ;;  %v1243_v26 = vld [vmem:[%s2245_s1 + $0x118] sm:$0xf0]  ;;  %v1322_v29 = vld [vmem:[%s2245_s1 + $0x14] sm:$0xf0] }
  0x24   :  { %543 = vmatpush.bf16.msrb.mxu0 %v1230_v41  ;;  %488 = vmatpush.bf16.msrb.mxu1 %v1178_v50  ;;  %v1150_v24 = vor.u32 %v1328_v20, %v1147_v21  ;;  %v1352_v25 = vld [vmem:[%s2245_s1 + $0x10c] sm:$0xf]  ;;  %v1114_v30 = vor.u32 %v1322_v29, %v1113_v27  ;;  %v1131_v32 = vld [vmem:[%s2245_s1 + $0x38] sm:$0xf0]  ;;  %v1089_v37 = vld [vmem:[%s2246_s0 + $0x20] sm:$0xf] }
  0x25   :  { %576 = vmatpush.bf16.msrb.mxu2 %v1294_v43  ;;  %1300 = vmatmul.msk.bf16.gmra.mxu3 %vm356_vm0, %v1660_v51  ;;  %v1246_v28 = vor.u32 %v1352_v25, %v1243_v26  ;;  %v1324_v31 = vld [vmem:[%s2245_s1 + $0x2c] sm:$0xf]  ;;  %v1115_v35 = vld [vmem:[%s2245_s1 + $0x18] sm:$0xf0]  ;;  %v1316_v38 = vld [vmem:[%s2246_s0 + $0x24] sm:$0xf0] }
  0x26   :  { %435 = vmatmul.bf16.vlgmr.msra.gmra.mxu2 %v1652_v47  ;;  %v1320_v33 = vld [vmem:[%s2245_s1 + $0xc] sm:$0xf]  ;;  %v1134_v34 = vor.u32 %v1324_v31, %v1131_v32  ;;  %v1317_v39 = vld [vmem:[%s2246_s0 + $0x34] sm:$0xf]  ;;  %v1099_v40 = vld [vmem:[%s2246_s0 + $0x38] sm:$0xf0]  ;;  %v1090_v41 = vor.u32 %v1316_v38, %v1089_v37 }
  0x27   :  { %1296 = vmatmul.msk.bf16.gmra.mxu1 %vm356_vm0, %v1660_v51  ;;  %v1118_v36 = vor.u32 %v1320_v33, %v1115_v35  ;;  %v1102_v42 = vor.u32 %v1317_v39, %v1099_v40  ;;  %v1097_v43 = vld [vmem:[%s2246_s0 + $0x30] sm:$0xf]  ;;  %v1318_v44 = vld [vmem:[%s2246_s0 + $0x34] sm:$0xf0] }
  0x28   :  { %544 = vmatpush.bf16.msrb.mxu0 %v1214_v52  ;;  %489 = vmatpush.bf16.msrb.mxu1 %v1162_v2  ;;  %v1098_v45 = vor.u32 %v1318_v44, %v1097_v43 }
  0x29   :  { %577 = vmatpush.bf16.msrb.mxu2 %v1278_v54 }
  0x2c   :  { %545 = vmatpush.bf16.msrb.mxu0 %v1198_v60  ;;  %490 = vmatpush.bf16.msrb.mxu1 %v1146_v10 }
  0x2d   :  { %578 = vmatpush.bf16.msrb.mxu2 %v1262_v1 }
  0x30   :  { %546 = vmatpush.bf16.msrb.mxu0 %v1182_v4  ;;  %491 = vmatpush.bf16.msrb.mxu1 %v1130_v19 }
  0x31   :  { %579 = vmatpush.bf16.msrb.mxu2 %v1246_v28 }
  0x33   :  { %382 = vmatmul.bf16.gmra.mxu0 %v1082_v22 }
  0x34   :  { %547 = vmatpush.bf16.msrb.mxu0 %v1166_v18  ;;  %492 = vmatpush.bf16.msrb.mxu1 %v1114_v30 }
  0x35   :  { %1301 = vmatmul.msk.bf16.gmra.mxu3 %vm356_vm0, %v1094_v23 }
  0x36   :  { %440 = vmatmul.bf16.gmra.mxu2 %v1082_v22 }
  0x37   :  { %1297 = vmatmul.msk.bf16.gmra.mxu1 %vm356_vm0, %v1094_v23 }
  0x38   :  { %548 = vmatpush.bf16.msrb.mxu0 %v1150_v24 }
  0x3c   :  { %549 = vmatpush.bf16.msrb.mxu0 %v1134_v34 }
  0x40   :  { %550 = vmatpush.bf16.msrb.mxu0 %v1118_v36 }
  0x43   :  { %387 = vmatmul.bf16.gmra.mxu0 %v1090_v41 }
  0x45   :  { %1302 = vmatmul.msk.bf16.gmra.mxu3 %vm356_vm0, %v1102_v42 }
  0x46   :  { %445 = vmatmul.bf16.gmra.mxu2 %v1090_v41 }
  0x47   :  { %1298 = vmatmul.msk.bf16.gmra.mxu1 %vm356_vm0, %v1102_v42 }
  0x53   :  { %392 = vmatmul.bf16.gmra.mxu0 %v1098_v45 }
  0x55   :  { %1303 = vmatmul.msk.bf16.vlgmr.msrb.gmra.mxu3 %vm356_vm0, %v1529_v53 }
  0x56   :  { %450 = vmatmul.bf16.gmra.mxu2 %v1098_v45 }
  0x57   :  { %493 = vmatmul.bf16.vlgmr.msrb.gmra.mxu1 %v1652_v47 }
  0x63   :  { %551 = vmatmul.bf16.vlgmr.msrb.gmra.mxu0 %v1652_v47 }
  0x65   :  { %1304 = vmatmul.msk.bf16.gmra.mxu3 %vm356_vm0, %v1660_v51 }
  0x66   :  { %1307 = vmatmul.msk.bf16.vlgmr.msrb.gmra.mxu2 %vm356_vm0, %v1529_v53 }
  0x67   :  { %498 = vmatmul.bf16.gmra.mxu1 %v1082_v22 }
  0x73   :  { %556 = vmatmul.bf16.gmra.mxu0 %v1082_v22 }
  0x75   :  { %1305 = vmatmul.msk.bf16.gmra.mxu3 %vm356_vm0, %v1094_v23 }
  0x76   :  { %1308 = vmatmul.msk.bf16.gmra.mxu2 %vm356_vm0, %v1660_v51 }
  0x77   :  { %503 = vmatmul.bf16.gmra.mxu1 %v1090_v41 }
  0x83   :  { %561 = vmatmul.bf16.gmra.mxu0 %v1090_v41 }
  0x85   :  { %1306 = vmatmul.msk.bf16.gmra.mxu3 %vm356_vm0, %v1102_v42  ;;  %v608_v40 = vpop.permute.xlu0 %607 }
  0x86   :  { %1309 = vmatmul.msk.bf16.gmra.mxu2 %vm356_vm0, %v1094_v23 }
  0x87   :  { %508 = vmatmul.bf16.gmra.mxu1 %v1098_v45 }
  0x93   :  { %566 = vmatmul.bf16.gmra.mxu0 %v1098_v45 }
  0x94   :  { %v407_v46 = vpop.f32.mrf.mxu1 }
  0x96   :  { %1310 = vmatmul.msk.bf16.gmra.mxu2 %vm356_vm0, %v1102_v42 }
  0x98   :  { %v465_v47 = vpop.f32.mrf.mxu3 }
  0x9c   :  { %v409_v53 = vpop.f32.mrf.mxu1 }
  0xa0   :  { %v467_v48 = vpop.f32.mrf.mxu3  ;;  %v378_v49 = vpop.f32.mrf.mxu0 }
  0xa1   :  { %v1797_v50 = vadd.f32 %v407_v46, %v378_v49 }
  0xa4   :  { %v412_v52 = vpop.f32.mrf.mxu1 }
  0xa8   :  { %v470_v51 = vpop.f32.mrf.mxu3  ;;  %v380_v56 = vpop.f32.mrf.mxu0 }
  0xa9   :  { %v436_v54 = vpop.f32.mrf.mxu2  ;;  %v1799_v57 = vadd.f32 %v409_v53, %v380_v56 }
  0xaa   :  { %v466_v55 = vadd.f32 %v465_v47, %v436_v54 }
  0xac   :  { %v414_v58 = vpop.f32.mrf.mxu1  ;;  %v1847_v49 = vadd.f32 %v608_v40, %v466_v55 }
  0xb0   :  { %v472_v60 = vpop.f32.mrf.mxu3  ;;  %v383_v62 = vpop.f32.mrf.mxu0 }
  0xb1   :  { %v438_v59 = vpop.f32.mrf.mxu2  ;;  %v1803_v63 = vadd.f32 %v412_v52, %v383_v62  ;;  %v657_v52 = vld [vmem:[%s2248_s2] sm:$0xf] }
  0xb2   :  { %v1801_v61 = vadd.f32 %v467_v48, %v438_v59  ;;  %v1859_v59 = vperm.slane %v657_v52, 1 }
  0xb4   :  { %v417_v0 = vpop.f32.mrf.mxu1 }
  0xb8   :  { %v475_v2 = vpop.f32.mrf.mxu3  ;;  %v385_v4 = vpop.f32.mrf.mxu0 }
  0xb9   :  { %v441_v1 = vpop.f32.mrf.mxu2  ;;  %v1807_v5 = vadd.f32 %v414_v58, %v385_v4  ;;  %v1869_v4 = vperm.slane %v657_v52, 2 }
  0xba   :  { %v1805_v3 = vadd.f32 %v470_v51, %v441_v1  ;;  %v1855_v51 = vadd.f32 %v608_v40, %v1797_v50 }
  0xbc   :  { %v419_v6 = vpop.f32.mrf.mxu1 }
  0xc0   :  { %v477_v8 = vpop.f32.mrf.mxu3  ;;  %v388_v10 = vpop.f32.mrf.mxu0 }
  0xc1   :  { %v443_v7 = vpop.f32.mrf.mxu2  ;;  %v418_v41 = vadd.f32 %v417_v0, %v388_v10  ;;  %v1865_v0 = vperm.slane %v657_v52, 0 }
  0xc2   :  { %v1809_v9 = vadd.f32 %v472_v60, %v443_v7  ;;  %v613_v7 = vpop.permute.xlu0 %612 }
  0xc3   :  { %v1845_v53 = vadd.f32 %v608_v40, %v418_v41  ;;  %v1886_v41 = vperm.slane %v657_v52, 3 }
  0xc4   :  { %v1811_v11 = vpop.f32.mrf.mxu1 }
  0xc5   :  { %v658_v55 = vadd.f32 %v1845_v53, %v1855_v51 }
  0xc8   :  { %v1813_v13 = vpop.f32.mrf.mxu3  ;;  %v390_v14 = vpop.f32.mrf.mxu0 }
  0xc9   :  { %v446_v12 = vpop.f32.mrf.mxu2  ;;  %v420_v62 = vadd.f32 %v419_v6, %v390_v14 }
  0xca   :  { %v476_v39 = vadd.f32 %v475_v2, %v446_v12 }
  0xcb   :  { %v1877_v6 = vadd.f32 %v613_v7, %v420_v62 }
  0xcc   :  { %v1815_v15 = vpop.f32.mrf.mxu1  ;;  %v1843_v46 = vadd.f32 %v608_v40, %v476_v39 }
  0xce   :  { %v659_v56 = vadd.f32 %v1843_v46, %v1847_v49 }
  0xd0   :  { %v1817_v17 = vpop.f32.mrf.mxu3  ;;  %v1819_v18 = vpop.f32.mrf.mxu0 }
  0xd1   :  { %v448_v16 = vpop.f32.mrf.mxu2 }
  0xd2   :  { %v478_v58 = vadd.f32 %v477_v8, %v448_v16 }
  0xd4   :  { %v494_v19 = vpop.f32.mrf.mxu1  ;;  %v1871_v8 = vadd.f32 %v613_v7, %v478_v58 }
  0xd8   :  { %v523_v21 = vpop.f32.mrf.mxu3  ;;  %v1823_v22 = vpop.f32.mrf.mxu0 }
  0xd9   :  { %v1821_v20 = vpop.f32.mrf.mxu2  ;;  %v524_v47 = vadd.f32 %v523_v21, %v494_v19  ;;  %v684_v19 = vmul.f32 %v1859_v59, %v659_v56  ;;  %v1875_v21 = vadd.f32 %v613_v7, %v1801_v61 }
  0xda   :  { %v481_v61 = vadd.f32 %v1813_v13, %v1821_v20 }
  0xdb   :  { %v1861_v60 = vadd.f32 %v608_v40, %v524_v47 }
  0xdc   :  { %v496_v23 = vpop.f32.mrf.mxu1 }
  0xe0   :  { %v525_v25 = vpop.f32.mrf.mxu3  ;;  %v552_v26 = vpop.f32.mrf.mxu0 }
  0xe1   :  { %v1825_v24 = vpop.f32.mrf.mxu2  ;;  %v526_v12 = vadd.f32 %v525_v25, %v496_v23  ;;  %v1890_v25 = vadd.f32 %v613_v7, %v1799_v57  ;;  %v423_v57 = vadd.f32 %v1811_v11, %v1819_v18 }
  0xe3   :  { %v662_v52 = vadd.f32 %v1877_v6, %v1890_v25 }
  0xe4   :  { %v1827_v27 = vpop.f32.mrf.mxu1 }
  0xe5   :  { %v687_v18 = vmul.f32 %v1865_v0, %v662_v52 }
  0xe8   :  { %v1829_v28 = vpop.f32.mrf.mxu3  ;;  %v554_v30 = vpop.f32.mrf.mxu0 }
  0xe9   :  { %v581_v29 = vpop.f32.mrf.mxu2 }
  0xea   :  { %v582_v1 = vadd.f32 %v581_v29, %v552_v26 }
  0xec   :  { %v1831_v31 = vpop.f32.mrf.mxu1  ;;  %v1879_v14 = vadd.f32 %v608_v40, %v582_v1 }
  0xf0   :  { %v1833_v32 = vpop.f32.mrf.mxu3  ;;  %v1835_v34 = vpop.f32.mrf.mxu0 }
  0xf1   :  { %v583_v33 = vpop.f32.mrf.mxu2 }
  0xf2   :  { %v584_v56 = vadd.f32 %v583_v33, %v554_v30 }
  0xf4   :  { %v504_v35 = vpop.f32.mrf.mxu1  ;;  %v1918_v33 = vadd.f32 %v613_v7, %v584_v56 }
  0xf8   :  { %v533_v36 = vpop.f32.mrf.mxu3  ;;  %v1839_v38 = vpop.f32.mrf.mxu0 }
  0xf9   :  { %v1837_v37 = vpop.f32.mrf.mxu2  ;;  %v534_v42 = vadd.f32 %v533_v36, %v504_v35  ;;  %v683_v35 = vmul.f32 %v1865_v0, %v658_v55 }
  0xfb   :  { %v1852_v54 = vadd.f32 %v608_v40, %v534_v42  ;;  %v699_v47 = vadd.f32 %v684_v19, %v683_v35  ;;  %v483_v35 = vadd.f32 %v1817_v17, %v1825_v24 }
  0xfc   :  { %v506_v43 = vpop.f32.mrf.mxu1 }
  0xfd   :  { %v660_v2 = vadd.f32 %v1852_v54, %v1861_v60 }
  0xff   :  { %v685_v23 = vmul.f32 %v1869_v4, %v660_v2 }
 0x100   :  { %v535_v44 = vpop.f32.mrf.mxu3  ;;  %v562_v48 = vpop.f32.mrf.mxu0 }
 0x101   :  { %v1841_v45 = vpop.f32.mrf.mxu2  ;;  %v536_v50 = vadd.f32 %v535_v44, %v506_v43  ;;  %v663_v43 = vadd.f32 %v1871_v8, %v1875_v21  ;;  %v1896_v44 = vadd.f32 %v613_v7, %v526_v12  ;;  %v700_v55 = vadd.f32 %v699_v47, %v685_v23 }
 0x103   :  { %v1882_v36 = vadd.f32 %v613_v7, %v536_v50  ;;  %v688_v2 = vmul.f32 %v1859_v59, %v663_v43  ;;  %v529_v50 = vadd.f32 %v1829_v28, %v1827_v27  ;;  %v587_v43 = vadd.f32 %v1837_v37, %v1835_v34 }
 0x104   :  { %v509_v26 = vpop.f32.mrf.mxu1 }
 0x105   :  { %v664_v13 = vadd.f32 %v1882_v36, %v1896_v44 }
 0x108   :  { %v538_v29 = vpop.f32.mrf.mxu3  ;;  %v564_v42 = vpop.f32.mrf.mxu0 }
 0x109   :  { %v591_v10 = vpop.f32.mrf.mxu2  ;;  %v539_v20 = vadd.f32 %v538_v29, %v509_v26  ;;  %v689_v26 = vmul.f32 %v1869_v4, %v664_v13 }
 0x10a   :  { %v592_v16 = vadd.f32 %v591_v10, %v562_v48  ;;  %v618_v48 = vpop.permute.xlu1 %617 }
 0x10b   :  { %v1907_v62 = vadd.f32 %v618_v48, %v481_v61  ;;  %v1913_v11 = vadd.f32 %v618_v48, %v1805_v3  ;;  %v1916_v30 = vadd.f32 %v618_v48, %v423_v57  ;;  %v1926_v27 = vadd.f32 %v618_v48, %v1803_v63 }
 0x10c   :  { %v1884_v39 = vadd.f32 %v608_v40, %v592_v16  ;;  %v1920_v16 = vadd.f32 %v618_v48, %v539_v20  ;;  %v511_v28 = vpop.f32.mrf.mxu1  ;;  %v1932_v23 = vadd.f32 %v618_v48, %v529_v50  ;;  %v704_v61 = vadd.f32 %v688_v2, %v687_v18 }
 0x10d   :  { %v667_v3 = vadd.f32 %v1907_v62, %v1913_v11  ;;  %v425_v63 = vadd.f32 %v1815_v15, %v1823_v22  ;;  %v531_v15 = vadd.f32 %v1833_v32, %v1831_v31 }
 0x10e   :  { %v661_v40 = vadd.f32 %v1884_v39, %v1879_v14  ;;  %v668_v47 = vadd.f32 %v1920_v16, %v1932_v23  ;;  %v705_v52 = vadd.f32 %v704_v61, %v689_v26 }
 0x10f   :  { %v692_v56 = vmul.f32 %v1859_v59, %v667_v3 }
 0x110   :  { %v686_v58 = vmul.f32 %v1886_v41, %v661_v40  ;;  %v540_v29 = vpop.f32.mrf.mxu3  ;;  %v567_v40 = vpop.f32.mrf.mxu0 }
 0x111   :  { %v593_v1 = vpop.f32.mrf.mxu2  ;;  %v541_v17 = vadd.f32 %v540_v29, %v511_v28 }
 0x112   :  { %v594_v10 = vadd.f32 %v593_v1, %v564_v42  ;;  %v701_v12 = vadd.f32 %v700_v55, %v686_v58  ;;  %v666_v42 = vadd.f32 %v1916_v30, %v1926_v27  ;;  %v623_v57 = vpop.permute.xlu1 %622  ;;  %v1956_v1 = vadd.f32 %v618_v48, %v587_v43 }
 0x113   :  { %v1946_v20 = vadd.f32 %v623_v57, %v483_v35  ;;  %v1951_v34 = vadd.f32 %v623_v57, %v1809_v9  ;;  %v1954_v55 = vadd.f32 %v623_v57, %v425_v63  ;;  %v1958_v2 = vadd.f32 %v623_v57, %v541_v17 }
 0x114   :  { %v1922_v19 = vadd.f32 %v613_v7, %v594_v10  ;;  %702 = vadd.xlane.f32.xlu2 %v701_v12  ;;  %v691_v37 = vmul.f32 %v1865_v0, %v666_v42  ;;  %v693_v10 = vmul.f32 %v1869_v4, %v668_v47  ;;  %v1964_v31 = vadd.f32 %v623_v57, %v1807_v5 }
 0x115   :  { %v671_v9 = vadd.f32 %v1946_v20, %v1951_v34  ;;  %v1968_v32 = vadd.f32 %v623_v57, %v531_v15 }
 0x116   :  { %v665_v7 = vadd.f32 %v1922_v19, %v1918_v33  ;;  %v709_v18 = vadd.f32 %v692_v56, %v691_v37  ;;  %v670_v26 = vadd.f32 %v1954_v55, %v1964_v31  ;;  %v931_v56 = vld [vmem:[%s2249_s5] sm:$0xff] }
 0x117   :  { %v672_v3 = vadd.f32 %v1958_v2, %v1968_v32 }
 0x118   :  { %v690_v24 = vmul.f32 %v1886_v41, %v665_v7  ;;  %v710_v28 = vadd.f32 %v709_v18, %v693_v10  ;;  %v569_v29 = vpop.f32.mrf.mxu0  ;;  %v696_v7 = vmul.f32 %v1859_v59, %v671_v9  ;;  %v695_v63 = vmul.f32 %v1865_v0, %v670_v26 }
 0x119   :  { %v596_v13 = vpop.f32.mrf.mxu2 }
 0x11a   :  { %v597_v22 = vadd.f32 %v596_v13, %v567_v40  ;;  %v706_v58 = vadd.f32 %v705_v52, %v690_v24  ;;  %v714_v47 = vadd.f32 %v696_v7, %v695_v63 }
 0x11c   :  { %v1960_v50 = vadd.f32 %v618_v48, %v597_v22  ;;  %707 = vadd.xlane.f32.xlu2 %v706_v58  ;;  %v589_v48 = vadd.f32 %v1841_v45, %v1839_v38  ;;  %v697_v38 = vmul.f32 %v1869_v4, %v672_v3 }
 0x11e   :  { %v669_v12 = vadd.f32 %v1960_v50, %v1956_v1  ;;  %v1981_v43 = vadd.f32 %v623_v57, %v589_v48  ;;  %v715_v24 = vadd.f32 %v714_v47, %v697_v38 }
 0x120   :  { %v694_v5 = vmul.f32 %v1886_v41, %v669_v12 }
 0x121   :  { %v598_v35 = vpop.f32.mrf.mxu2 }
 0x122   :  { %v599_v61 = vadd.f32 %v598_v35, %v569_v29  ;;  %v711_v42 = vadd.f32 %v710_v28, %v694_v5 }
 0x124   :  { %v1983_v40 = vadd.f32 %v623_v57, %v599_v61  ;;  %712 = vadd.xlane.f32.xlu0 %v711_v42 }
 0x126   :  { %v673_v45 = vadd.f32 %v1983_v40, %v1981_v43 }
 0x128   :  { %v698_v17 = vmul.f32 %v1886_v41, %v673_v45 }
 0x12a   :  { %v716_v52 = vadd.f32 %v715_v24, %v698_v17 }
 0x12c   :  { %717 = vadd.xlane.f32.xlu1 %v716_v52 }
 0x138   :  { %937 = vperm.xlu0 %1368, %v931_v56  }
 0x187   :  { %v703_v13 = vpop.xlane.xlu2 %702 }
 0x188   :  { %v719_v57 = vmul.f32 0.001953125, %v703_v13 }
 0x18a   :  { %v1993_v15 = vsub.f32 %v1855_v51, %v719_v57  ;;  %v1996_v22 = vsub.f32 %v1847_v49, %v719_v57  ;;  %v1999_v58 = vsub.f32 %v1861_v60, %v719_v57  ;;  %v2002_v37 = vsub.f32 %v1879_v14, %v719_v57 }
 0x18b   :  { %v2005_v10 = vsub.f32 %v1845_v53, %v719_v57  ;;  %v2008_v9 = vsub.f32 %v1843_v46, %v719_v57  ;;  %v2011_v12 = vsub.f32 %v1852_v54, %v719_v57  ;;  %v2014_v51 = vsub.f32 %v1884_v39, %v719_v57 }
 0x18c   :  { %v755_v49 = vmul.f32 %v1993_v15, %v1993_v15  ;;  %v756_v60 = vmul.f32 %v1996_v22, %v1996_v22  ;;  %v757_v14 = vmul.f32 %v1999_v58, %v1999_v58  ;;  %v758_v53 = vmul.f32 %v2002_v37, %v2002_v37 }
 0x18d   :  { %v771_v46 = vmul.f32 %v2005_v10, %v2005_v10  ;;  %v772_v54 = vmul.f32 %v2008_v9, %v2008_v9  ;;  %v773_v39 = vmul.f32 %v2011_v12, %v2011_v12  ;;  %v774_v18 = vmul.f32 %v2014_v51, %v2014_v51 }
 0x18f   :  { %v708_v26 = vpop.xlane.xlu2 %707  ;;  %v787_v48 = vadd.f32 %v771_v46, %v755_v49  ;;  %v788_v3 = vadd.f32 %v772_v54, %v756_v60  ;;  %v789_v5 = vadd.f32 %v773_v39, %v757_v14  ;;  %v790_v28 = vadd.f32 %v774_v18, %v758_v53 }
 0x190   :  { %v720_v29 = vmul.f32 0.001953125, %v708_v26 }
 0x191   :  { %v803_v35 = vmul.f32 %v787_v48, %v1865_v0  ;;  %v804_v7 = vmul.f32 %v788_v3, %v1859_v59  ;;  %v805_v61 = vmul.f32 %v789_v5, %v1869_v4  ;;  %v806_v42 = vmul.f32 %v790_v28, %v1886_v41 }
 0x192   :  { %v2037_v63 = vsub.f32 %v1890_v25, %v720_v29  ;;  %v2040_v38 = vsub.f32 %v1875_v21, %v720_v29  ;;  %v2043_v45 = vsub.f32 %v1896_v44, %v720_v29  ;;  %v2046_v47 = vsub.f32 %v1918_v33, %v720_v29 }
 0x193   :  { %v819_v17 = vadd.f32 %v804_v7, %v803_v35  ;;  %v2049_v24 = vsub.f32 %v1877_v6, %v720_v29  ;;  %v2052_v52 = vsub.f32 %v1871_v8, %v720_v29  ;;  %v2055_v56 = vsub.f32 %v1882_v36, %v720_v29 }
 0x194   :  { %v2058_v25 = vsub.f32 %v1922_v19, %v720_v29  ;;  %v759_v21 = vmul.f32 %v2037_v63, %v2037_v63  ;;  %v760_v44 = vmul.f32 %v2040_v38, %v2040_v38  ;;  %v761_v33 = vmul.f32 %v2043_v45, %v2043_v45 }
 0x195   :  { %v820_v6 = vadd.f32 %v819_v17, %v805_v61  ;;  %v762_v8 = vmul.f32 %v2046_v47, %v2046_v47  ;;  %v775_v36 = vmul.f32 %v2049_v24, %v2049_v24  ;;  %v776_v19 = vmul.f32 %v2052_v52, %v2052_v52 }
 0x196   :  { %v777_v13 = vmul.f32 %v2055_v56, %v2055_v56  ;;  %v778_v57 = vmul.f32 %v2058_v25, %v2058_v25 }
 0x197   :  { %v713_v49 = vpop.xlane.xlu0 %712  ;;  %v821_v60 = vadd.f32 %v820_v6, %v806_v42  ;;  %v791_v14 = vadd.f32 %v775_v36, %v759_v21  ;;  %v792_v53 = vadd.f32 %v776_v19, %v760_v44 }
 0x198   :  { %v721_v46 = vmul.f32 0.001953125, %v713_v49  ;;  %v793_v54 = vadd.f32 %v777_v13, %v761_v33  ;;  %v794_v39 = vadd.f32 %v778_v57, %v762_v8 }
 0x199   :  { %822 = vadd.xlane.f32.xlu2 %v821_v60  ;;  %v807_v18 = vmul.f32 %v791_v14, %v1865_v0  ;;  %v808_v26 = vmul.f32 %v792_v53, %v1859_v59 }
 0x19a   :  { %v809_v48 = vmul.f32 %v793_v54, %v1869_v4  ;;  %v810_v3 = vmul.f32 %v794_v39, %v1886_v41  ;;  %v2081_v5 = vsub.f32 %v1926_v27, %v721_v46  ;;  %v2084_v28 = vsub.f32 %v1913_v11, %v721_v46 }
 0x19b   :  { %v824_v29 = vadd.f32 %v808_v26, %v807_v18  ;;  %v2087_v35 = vsub.f32 %v1932_v23, %v721_v46  ;;  %v2090_v7 = vsub.f32 %v1956_v1, %v721_v46  ;;  %v2093_v61 = vsub.f32 %v1916_v30, %v721_v46 }
 0x19c   :  { %v2096_v42 = vsub.f32 %v1907_v62, %v721_v46  ;;  %v2099_v17 = vsub.f32 %v1920_v16, %v721_v46  ;;  %v2102_v27 = vsub.f32 %v1960_v50, %v721_v46  ;;  %v763_v11 = vmul.f32 %v2081_v5, %v2081_v5 }
 0x19d   :  { %v825_v23 = vadd.f32 %v824_v29, %v809_v48  ;;  %v764_v1 = vmul.f32 %v2084_v28, %v2084_v28  ;;  %v765_v30 = vmul.f32 %v2087_v35, %v2087_v35  ;;  %v766_v62 = vmul.f32 %v2090_v7, %v2090_v7 }
 0x19e   :  { %v779_v16 = vmul.f32 %v2093_v61, %v2093_v61  ;;  %v780_v50 = vmul.f32 %v2096_v42, %v2096_v42  ;;  %v781_v21 = vmul.f32 %v2099_v17, %v2099_v17  ;;  %v782_v44 = vmul.f32 %v2102_v27, %v2102_v27 }
 0x19f   :  { %v718_v33 = vpop.xlane.xlu1 %717  ;;  %v826_v6 = vadd.f32 %v825_v23, %v810_v3 }
 0x1a0   :  { %v722_v8 = vmul.f32 0.001953125, %v718_v33  ;;  %v795_v36 = vadd.f32 %v779_v16, %v763_v11  ;;  %v796_v19 = vadd.f32 %v780_v50, %v764_v1  ;;  %v797_v13 = vadd.f32 %v781_v21, %v765_v30 }
 0x1a1   :  { %827 = vadd.xlane.f32.xlu2 %v826_v6  ;;  %v798_v57 = vadd.f32 %v782_v44, %v766_v62 }
 0x1a2   :  { %v811_v49 = vmul.f32 %v795_v36, %v1865_v0  ;;  %v812_v60 = vmul.f32 %v796_v19, %v1859_v59  ;;  %v813_v14 = vmul.f32 %v797_v13, %v1869_v4  ;;  %v2124_v53 = vsub.f32 %v1964_v31, %v722_v8 }
 0x1a3   :  { %v814_v46 = vmul.f32 %v798_v57, %v1886_v41  ;;  %v2128_v54 = vsub.f32 %v1951_v34, %v722_v8  ;;  %v2131_v39 = vsub.f32 %v1968_v32, %v722_v8  ;;  %v2134_v18 = vsub.f32 %v1981_v43, %v722_v8 }
 0x1a4   :  { %v829_v26 = vadd.f32 %v812_v60, %v811_v49  ;;  %v2137_v48 = vsub.f32 %v1954_v55, %v722_v8  ;;  %v2140_v3 = vsub.f32 %v1946_v20, %v722_v8  ;;  %v2143_v31 = vsub.f32 %v1958_v2, %v722_v8 }
 0x1a5   :  { %v2146_v29 = vsub.f32 %v1983_v40, %v722_v8  ;;  %v767_v34 = vmul.f32 %v2124_v53, %v2124_v53  ;;  %v768_v32 = vmul.f32 %v2128_v54, %v2128_v54  ;;  %v769_v43 = vmul.f32 %v2131_v39, %v2131_v39 }
 0x1a6   :  { %v830_v55 = vadd.f32 %v829_v26, %v813_v14  ;;  %v770_v20 = vmul.f32 %v2134_v18, %v2134_v18  ;;  %v783_v2 = vmul.f32 %v2137_v48, %v2137_v48  ;;  %v784_v40 = vmul.f32 %v2140_v3, %v2140_v3 }
 0x1a7   :  { %v785_v11 = vmul.f32 %v2143_v31, %v2143_v31  ;;  %v786_v23 = vmul.f32 %v2146_v29, %v2146_v29 }
 0x1a8   :  { %v831_v1 = vadd.f32 %v830_v55, %v814_v46  ;;  %v799_v30 = vadd.f32 %v783_v2, %v767_v34  ;;  %v800_v62 = vadd.f32 %v784_v40, %v768_v32  ;;  %v843_v2 = vld [vmem:[%s2250_s4] sm:$0xff] }
 0x1a9   :  { %v801_v16 = vadd.f32 %v785_v11, %v769_v43  ;;  %v802_v50 = vadd.f32 %v786_v23, %v770_v20 }
 0x1aa   :  { %832 = vadd.xlane.f32.xlu2 %v831_v1  ;;  %v815_v21 = vmul.f32 %v799_v30, %v1865_v0  ;;  %v816_v44 = vmul.f32 %v800_v62, %v1859_v59 }
 0x1ab   :  { %v817_v33 = vmul.f32 %v801_v16, %v1869_v4  ;;  %v818_v8 = vmul.f32 %v802_v50, %v1886_v41 }
 0x1ac   :  { %v834_v6 = vadd.f32 %v816_v44, %v815_v21 }
 0x1ae   :  { %v835_v36 = vadd.f32 %v834_v6, %v817_v33  ;;  %v844_v33 = vld [vmem:[%s2250_s4 + $0x8] sm:$0xff] }
 0x1b0   :  { %v836_v19 = vadd.f32 %v835_v36, %v818_v8 }
 0x1b2   :  { %837 = vadd.xlane.f32.xlu2 %v836_v19 }
 0x20c   :  { %v823_v13 = vpop.xlane.xlu2 %822 }
 0x20d   :  { %v839_v57 = vmul.f32 0.001953125, %v823_v13 }
 0x20f   :  { %v847_v49 = vadd.f32 1e-05, %v839_v57 }
 0x211   :  { %1371 = vrsqrt.f32 %v847_v49  ;;  %vm857_vm2 = vweird.f32 %v847_v49 }
 0x214   :  { %v828_v60 = vpop.xlane.xlu2 %827 }
 0x215   :  { %v840_v14 = vmul.f32 0.001953125, %v828_v60 }
 0x217   :  { %v1372_v46 = vpop.eup %1371  ;;  %v848_v26 = vadd.f32 1e-05, %v840_v14 }
 0x218   :  { %v852_v34 = vmul.f32 %v1372_v46, %v847_v49  ;;  %vm858_vm1 = vweird.f32 %v1372_v46 }
 0x219   :  { %1373 = vrsqrt.f32 %v848_v26  ;;  %vm859_vm3 = vmor %vm857_vm2, %vm858_vm1  ;;  %vm867_vm5 = vweird.f32 %v848_v26 }
 0x21a   :  { %v853_v0 = vmul.f32 %v1372_v46, %v852_v34  ;;  %v934_v34 = vld [vmem:[%s2249_s5 + $0x18] sm:$0xff] }
 0x21c   :  { %v854_v59 = vmul.f32 0.5, %v853_v0 }
 0x21d   :  { %v833_v32 = vpop.xlane.xlu2 %832 }
 0x21e   :  { %v855_v4 = vsub.f32 1.5, %v854_v59  ;;  %v841_v43 = vmul.f32 0.001953125, %v833_v32 }
 0x21f   :  { %v1374_v41 = vpop.eup %1373 }
 0x220   :  { %v862_v55 = vmul.f32 %v1374_v41, %v848_v26  ;;  %v849_v20 = vadd.f32 1e-05, %v841_v43  ;;  %v856_v40 = vmul.f32 %v1372_v46, %v855_v4  ;;  %vm868_vm4 = vweird.f32 %v1374_v41 }
 0x221   :  { %vm869_vm6 = vmor %vm867_vm5, %vm868_vm4 }
 0x222   :  { %v863_v11 = vmul.f32 %v1374_v41, %v862_v55  ;;  %1375 = vrsqrt.f32 %v849_v20  ;;  %v860_v23 = vsel %vm859_vm3, %v1372_v46, %v856_v40  ;;  %vm877_vm8 = vweird.f32 %v849_v20  ;;  %v845_v46 = vld [vmem:[%s2250_s4 + $0x10] sm:$0xff] }
 0x223   :  { %v891_v1 = vmul.f32 %v860_v23, %v843_v2 }
 0x224   :  { %v864_v30 = vmul.f32 0.5, %v863_v11  ;;  %v932_v11 = vld [vmem:[%s2249_s5 + $0x8] sm:$0xff] }
 0x225   :  { %v838_v62 = vpop.xlane.xlu2 %837  ;;  %897 = vperm.xlu2 %1370, %v891_v1  }
 0x226   :  { %v865_v16 = vsub.f32 1.5, %v864_v30  ;;  %v842_v50 = vmul.f32 0.001953125, %v838_v62 }
 0x228   :  { %v1376_v21 = vpop.eup %1375  ;;  %v850_v44 = vadd.f32 1e-05, %v842_v50  ;;  %v866_v6 = vmul.f32 %v1374_v41, %v865_v16  ;;  %v938_v50 = vpop.permute.xlu0 %937 }
 0x229   :  { %v872_v8 = vmul.f32 %v1376_v21, %v849_v20  ;;  %vm878_vm7 = vweird.f32 %v1376_v21  ;;  %v933_v20 = vld [vmem:[%s2249_s5 + $0x10] sm:$0xff] }
 0x22a   :  { %1377 = vrsqrt.f32 %v850_v44  ;;  %v870_v36 = vsel %vm869_vm6, %v1374_v41, %v866_v6  ;;  %vm879_vm9 = vmor %vm877_vm8, %vm878_vm7  ;;  %vm887_vm11 = vweird.f32 %v850_v44  ;;  %v846_v41 = vld [vmem:[%s2250_s4 + $0x18] sm:$0xff] }
 0x22b   :  { %v873_v19 = vmul.f32 %v1376_v21, %v872_v8  ;;  %v892_v13 = vmul.f32 %v870_v36, %v844_v33 }
 0x22d   :  { %v874_v57 = vmul.f32 0.5, %v873_v19  ;;  %902 = vperm.xlu0 %1368, %v892_v13  }
 0x22f   :  { %v875_v49 = vsub.f32 1.5, %v874_v57 }
 0x230   :  { %v1378_v60 = vpop.eup %1377 }
 0x231   :  { %v882_v14 = vmul.f32 %v1378_v60, %v850_v44  ;;  %v876_v26 = vmul.f32 %v1376_v21, %v875_v49  ;;  %vm888_vm10 = vweird.f32 %v1378_v60 }
 0x232   :  { %vm889_vm12 = vmor %vm887_vm11, %vm888_vm10 }
 0x233   :  { %v883_v0 = vmul.f32 %v1378_v60, %v882_v14  ;;  %v880_v59 = vsel %vm879_vm9, %v1376_v21, %v876_v26 }
 0x234   :  { %v893_v32 = vmul.f32 %v880_v59, %v845_v46 }
 0x235   :  { %v884_v4 = vmul.f32 0.5, %v883_v0  ;;  %952 = vperm.xlu0 %1368, %v934_v34  }
 0x236   :  { %907 = vperm.xlu1 %1369, %v893_v32  }
 0x237   :  { %v885_v43 = vsub.f32 1.5, %v884_v4 }
 0x239   :  { %v886_v55 = vmul.f32 %v1378_v60, %v885_v43 }
 0x23b   :  { %v890_v2 = vsel %vm889_vm12, %v1378_v60, %v886_v55 }
 0x23c   :  { %v894_v40 = vmul.f32 %v890_v2, %v846_v41 }
 0x23e   :  { %947 = vperm.xlu1 %1369, %v933_v20   ;;  %912 = vperm.xlu2 %1370, %v894_v40  }
 0x246   :  { %942 = vperm.xlu2 %1370, %v932_v11  }
 0x27f   :  { %v898_v23 = vpop.permute.xlu2 %897 }
 0x280   :  { %v915_v1 = vmul.f32 %v898_v23, %v1993_v15  ;;  %v916_v30 = vmul.f32 %v898_v23, %v1996_v22  ;;  %v917_v62 = vmul.f32 %v898_v23, %v1999_v58  ;;  %v918_v16 = vmul.f32 %v898_v23, %v2002_v37 }
 0x281   :  { %v987_v21 = vmul.f32 %v898_v23, %v2005_v10  ;;  %v988_v44 = vmul.f32 %v898_v23, %v2008_v9  ;;  %v989_v33 = vmul.f32 %v898_v23, %v2011_v12  ;;  %v990_v6 = vmul.f32 %v898_v23, %v2014_v51 }
 0x282   :  { %v955_v8 = vadd.f32 %v938_v50, %v915_v1  ;;  %v956_v36 = vadd.f32 %v938_v50, %v916_v30  ;;  %v957_v19 = vadd.f32 %v938_v50, %v917_v62  ;;  %v958_v13 = vadd.f32 %v938_v50, %v918_v16 }
 0x283   :  { %v1003_v15 = vadd.f32 %v987_v21, %v938_v50  ;;  %v1004_v57 = vadd.f32 %v988_v44, %v938_v50  ;;  %v1005_v22 = vadd.f32 %v989_v33, %v938_v50  ;;  %v1006_v49 = vadd.f32 %v990_v6, %v938_v50 }
 0x284   :  { %v971_v58 = vmax.f32 %v955_v8, 0.0  ;;  %v972_v60 = vmax.f32 %v956_v36, 0.0  ;;  %v973_v37 = vmax.f32 %v957_v19, 0.0  ;;  %v974_v14 = vmax.f32 %v958_v13, 0.0 }
 0x285   :  { %v1019_v46 = vmax.f32 %v1003_v15, 0.0  ;;  %v1020_v10 = vmax.f32 %v1004_v57, 0.0  ;;  %v1021_v26 = vmax.f32 %v1005_v22, 0.0  ;;  %v1022_v9 = vmax.f32 %v1006_v49, 0.0 }
 0x287   :  { %v1035_v34 = vmax.f32 %v971_v58, %v1019_v46  ;;  %v1036_v12 = vmax.f32 %v972_v60, %v1020_v10  ;;  %v1037_v0 = vmax.f32 %v973_v37, %v1021_v26  ;;  %v1038_v51 = vmax.f32 %v974_v14, %v1022_v9 }
 0x289   :  { %v1051_v59 = vmax.f32 %v1035_v34, %v1037_v0  ;;  %v1052_v32 = vmax.f32 %v1036_v12, %v1038_v51 }
 0x28b   :  { %1059 = vst [vmem:[%s2251_s6] sm:$0xff] %v1051_v59 }
 0x28c   :  { %1060 = vst [vmem:[%s2251_s6 + $0x8] sm:$0xff] %v1052_v32 }
 0x298   :  { %v913_v4 = vpop.permute.xlu2 %912 }
 0x299   :  { %v927_v41 = vmul.f32 %v913_v4, %v2124_v53  ;;  %v928_v55 = vmul.f32 %v913_v4, %v2128_v54  ;;  %v929_v20 = vmul.f32 %v913_v4, %v2131_v39  ;;  %v930_v2 = vmul.f32 %v913_v4, %v2134_v18 }
 0x29a   :  { %v1001_v13 = vmul.f32 %v913_v4, %v2143_v31  ;;  %v1002_v15 = vmul.f32 %v913_v4, %v2146_v29 }
 0x29f   :  { %v903_v43 = vpop.permute.xlu0 %902 }
 0x2a0   :  { %v919_v40 = vmul.f32 %v903_v43, %v2037_v63  ;;  %v920_v11 = vmul.f32 %v903_v43, %v2040_v38  ;;  %v921_v23 = vmul.f32 %v903_v43, %v2043_v45  ;;  %v922_v1 = vmul.f32 %v903_v43, %v2046_v47  ;;  %v943_v16 = vpop.permute.xlu2 %942 }
 0x2a1   :  { %v991_v30 = vmul.f32 %v903_v43, %v2049_v24  ;;  %v992_v62 = vmul.f32 %v903_v43, %v2052_v52  ;;  %v993_v53 = vmul.f32 %v903_v43, %v2055_v56  ;;  %v994_v54 = vmul.f32 %v903_v43, %v2058_v25 }
 0x2a2   :  { %v959_v39 = vadd.f32 %v943_v16, %v919_v40  ;;  %v960_v50 = vadd.f32 %v943_v16, %v920_v11  ;;  %v961_v18 = vadd.f32 %v943_v16, %v921_v23  ;;  %v962_v21 = vadd.f32 %v943_v16, %v922_v1 }
 0x2a3   :  { %v1007_v63 = vadd.f32 %v991_v30, %v943_v16  ;;  %v1008_v44 = vadd.f32 %v992_v62, %v943_v16  ;;  %v1009_v38 = vadd.f32 %v993_v53, %v943_v16  ;;  %v1010_v33 = vadd.f32 %v994_v54, %v943_v16 }
 0x2a4   :  { %v975_v45 = vmax.f32 %v959_v39, 0.0  ;;  %v976_v6 = vmax.f32 %v960_v50, 0.0  ;;  %v977_v47 = vmax.f32 %v961_v18, 0.0  ;;  %v978_v8 = vmax.f32 %v962_v21, 0.0 }
 0x2a5   :  { %v1023_v24 = vmax.f32 %v1007_v63, 0.0  ;;  %v1024_v36 = vmax.f32 %v1008_v44, 0.0  ;;  %v1025_v52 = vmax.f32 %v1009_v38, 0.0  ;;  %v1026_v19 = vmax.f32 %v1010_v33, 0.0 }
 0x2a6   :  { %v999_v56 = vmul.f32 %v913_v4, %v2137_v48  ;;  %v1000_v25 = vmul.f32 %v913_v4, %v2140_v3 }
 0x2a7   :  { %v1039_v57 = vmax.f32 %v975_v45, %v1023_v24  ;;  %v1040_v22 = vmax.f32 %v976_v6, %v1024_v36  ;;  %v1041_v49 = vmax.f32 %v977_v47, %v1025_v52  ;;  %v1042_v58 = vmax.f32 %v978_v8, %v1026_v19  ;;  %v953_v60 = vpop.permute.xlu0 %952 }
 0x2a8   :  { %v967_v37 = vadd.f32 %v953_v60, %v927_v41  ;;  %v968_v14 = vadd.f32 %v953_v60, %v928_v55  ;;  %v969_v46 = vadd.f32 %v953_v60, %v929_v20  ;;  %v970_v10 = vadd.f32 %v953_v60, %v930_v2  ;;  %v908_v26 = vpop.permute.xlu1 %907 }
 0x2a9   :  { %v1053_v9 = vmax.f32 %v1039_v57, %v1041_v49  ;;  %v1054_v34 = vmax.f32 %v1040_v22, %v1042_v58  ;;  %v1015_v12 = vadd.f32 %v999_v56, %v953_v60  ;;  %v1016_v48 = vadd.f32 %v1000_v25, %v953_v60 }
 0x2aa   :  { %v983_v0 = vmax.f32 %v967_v37, 0.0  ;;  %v984_v3 = vmax.f32 %v968_v14, 0.0  ;;  %v985_v51 = vmax.f32 %v969_v46, 0.0  ;;  %v986_v31 = vmax.f32 %v970_v10, 0.0 }
 0x2ab   :  { %1061 = vst [vmem:[%s2251_s6 + $0x10] sm:$0xff] %v1053_v9  ;;  %v1017_v29 = vadd.f32 %v1001_v13, %v953_v60  ;;  %v1018_v59 = vadd.f32 %v1002_v15, %v953_v60  ;;  %v1031_v32 = vmax.f32 %v1015_v12, 0.0  ;;  %v1032_v4 = vmax.f32 %v1016_v48, 0.0 }
 0x2ac   :  { %1062 = vst [vmem:[%s2251_s6 + $0x18] sm:$0xff] %v1054_v34  ;;  %v923_v2 = vmul.f32 %v908_v26, %v2081_v5  ;;  %v924_v40 = vmul.f32 %v908_v26, %v2084_v28  ;;  %v925_v1 = vmul.f32 %v908_v26, %v2087_v35  ;;  %v926_v30 = vmul.f32 %v908_v26, %v2090_v7 }
 0x2ad   :  { %v1033_v43 = vmax.f32 %v1017_v29, 0.0  ;;  %v1034_v41 = vmax.f32 %v1018_v59, 0.0  ;;  %v1047_v55 = vmax.f32 %v983_v0, %v1031_v32  ;;  %v1048_v20 = vmax.f32 %v984_v3, %v1032_v4 }
 0x2ae   :  { %v995_v62 = vmul.f32 %v908_v26, %v2093_v61  ;;  %v996_v53 = vmul.f32 %v908_v26, %v2096_v42  ;;  %v997_v54 = vmul.f32 %v908_v26, %v2099_v17  ;;  %v998_v16 = vmul.f32 %v908_v26, %v2102_v27 }
 0x2af   :  { %v1049_v11 = vmax.f32 %v985_v51, %v1033_v43  ;;  %v1050_v23 = vmax.f32 %v986_v31, %v1034_v41 }
 0x2b0   :  { %v948_v39 = vpop.permute.xlu1 %947 }
 0x2b1   :  { %v1057_v50 = vmax.f32 %v1047_v55, %v1049_v11  ;;  %v1058_v18 = vmax.f32 %v1048_v20, %v1050_v23  ;;  %v963_v5 = vadd.f32 %v948_v39, %v923_v2  ;;  %v964_v21 = vadd.f32 %v948_v39, %v924_v40 }
 0x2b2   :  { %v965_v28 = vadd.f32 %v948_v39, %v925_v1  ;;  %v966_v63 = vadd.f32 %v948_v39, %v926_v30  ;;  %v1011_v44 = vadd.f32 %v995_v62, %v948_v39  ;;  %v1012_v38 = vadd.f32 %v996_v53, %v948_v39 }
 0x2b3   :  { %1065 = vst [vmem:[%s2251_s6 + $0x30] sm:$0xff] %v1057_v50  ;;  %v979_v35 = vmax.f32 %v963_v5, 0.0  ;;  %v980_v7 = vmax.f32 %v964_v21, 0.0  ;;  %v1013_v61 = vadd.f32 %v997_v54, %v948_v39  ;;  %v1014_v42 = vadd.f32 %v998_v16, %v948_v39 }
 0x2b4   :  { %1066 = vst [vmem:[%s2251_s6 + $0x38] sm:$0xff] %v1058_v18  ;;  %v981_v17 = vmax.f32 %v965_v28, 0.0  ;;  %v982_v27 = vmax.f32 %v966_v63, 0.0  ;;  %v1027_v33 = vmax.f32 %v1011_v44, 0.0  ;;  %v1028_v45 = vmax.f32 %v1012_v38, 0.0 }
 0x2b5   :  { %v1029_v6 = vmax.f32 %v1013_v61, 0.0  ;;  %v1030_v47 = vmax.f32 %v1014_v42, 0.0 }
 0x2b6   :  { %v1043_v8 = vmax.f32 %v979_v35, %v1027_v33  ;;  %v1044_v24 = vmax.f32 %v980_v7, %v1028_v45 }
 0x2b7   :  { %v1045_v36 = vmax.f32 %v981_v17, %v1029_v6  ;;  %v1046_v52 = vmax.f32 %v982_v27, %v1030_v47 }
 0x2b9   :  { %v1055_v19 = vmax.f32 %v1043_v8, %v1045_v36  ;;  %v1056_v56 = vmax.f32 %v1044_v24, %v1046_v52 }
 0x2bb   :  { %1063 = vst [vmem:[%s2251_s6 + $0x20] sm:$0xff] %v1055_v19 }
 0x2bc   :  { %1064 = vst [vmem:[%s2251_s6 + $0x28] sm:$0xff] %v1056_v56 }

</bundles_post_ra>
